<compile_context>
chip_gen: v7x
topology: tpu7x:2x2x1
jax: 0.10.0
libtpu: 0.0.40
codegen_flags: <defaults>
</compile_context>

<pallas_src>
import jax
import jax.numpy as jnp
import numpy as np
from jax import lax
from jax.experimental import pallas as pl
from jax.experimental.pallas import tpu as pltpu

N_BRANCH = 5
KH = KW = 3


def _make_kernel(BB, H, W, Wp, Cin, Cout):
    """One grid step: BB images, fused (branch-summed) 3x3 conv via 9 accumulated matmuls."""
    M = BB * H * W

    def kernel(x_ref, w_ref, b_ref, o_ref, xp_ref):
        # x_ref : (BB, H, W, Cin)        unpadded NHWC input block
        # w_ref : (KH*KW, Cin, Cout)     branch-summed per-tap weights
        # b_ref : (1, Cout)              branch-summed bias
        # o_ref : (BB, H, W, Cout)
        # xp_ref: (BB, H+2, Wp, Cin)     zero-padded input scratch (Wp = roundup(W+2, 8))
        dt = xp_ref.dtype

        # Halo-only zeroing: the interior is fully overwritten below, so only the padding ring
        # (rows 0 / H+1 along the outer H axis, cols 0 / W+1 along the sublane W axis) is cleared.
        row0 = jnp.zeros((BB, 1, Wp, Cin), dt)
        xp_ref[:, 0:1, :, :] = row0
        xp_ref[:, H + 1:H + 2, :, :] = row0
        col0 = jnp.zeros((BB, H + 2, 1, Cin), dt)
        xp_ref[:, :, 0:1, :] = col0
        xp_ref[:, :, W + 1:W + 2, :] = col0

        # Interior: write the current input block into the padded scratch.
        xp_ref[:, 1:H + 1, 1:W + 1, :] = x_ref[...]

        # 9 per-tap matmuls, each patch streamed straight from the scratch ref (no slab temp),
        # accumulated in f32.  K = Cin = 128 maps cleanly onto all MXU generations.
        acc = jnp.zeros((M, Cout), jnp.float32)
        for kh in range(KH):
            for kw in range(KW):
                patch = xp_ref[:, kh:kh + H, kw:kw + W, :].reshape(M, Cin)
                acc = acc + jnp.dot(patch, w_ref[kh * KW + kw],
                                    preferred_element_type=jnp.float32)

        out = acc + b_ref[...]                                    # (1, Cout) broadcast
        o_ref[...] = out.reshape(BB, H, W, Cout).astype(o_ref.dtype)

    return kernel


def _two_tensorcores_per_chip():
    """True if each chip has >1 TensorCore sharing the grid (e.g. v7x); v5e/v6e are single-TC."""
    try:
        kind = jax.devices()[0].device_kind.lower()
    except Exception:
        return True  # conservative: keep grid >= 2
    single_tc = ("lite" in kind) or ("v5e" in kind) or ("v6e" in kind)
    return not single_tc


def _pick_images_per_block(N, H, W, Cin, Cout, itemsize, two_tc):
    """Largest divisor of N whose M = bb*H*W fills (but does not exceed) the 256-wide MXU M dim,
    keeping grid >= 2 on two-TC chips and staying well under the scoped VMEM budget."""
    rows = H * W
    wp = ((W + 2 + 7) // 8) * 8
    best = 1
    for bb in range(1, N + 1):
        if N % bb:
            continue
        if two_tc and N >= 2 and (N // bb) < 2:
            continue                      # keep both TensorCores busy
        if bb > 1 and bb * rows > 256:
            continue                      # MXU M dimension already filled
        # Conservative VMEM estimate: padded scratch + double-buffered in/out blocks.
        vmem = (bb * (H + 2) * wp * Cin + 2 * bb * rows * Cin + 2 * bb * rows * Cout) * itemsize
        if vmem > 24 * 1024 * 1024:
            continue
        best = bb
    return best


def parallel_branches(x_nchw, w_oihw_stack, b_stack, *, images_per_block=None):
    """y = sum_i conv_i(x) == conv(x, sum_i w_i) + sum_i b_i.

    x_nchw: (N, Cin, H, W); w_oihw_stack: (5, Cout, Cin, 3, 3); b_stack: (5, Cout).
    """
    N, Cin, H, W = x_nchw.shape
    Cout = w_oihw_stack.shape[1]

    # Branch fold (exact): sum weights/biases across the 5 branches once.
    w_sum = jnp.sum(w_oihw_stack, axis=0)                      # (Cout, Cin, KH, KW)
    w_taps = jnp.transpose(w_sum, (2, 3, 1, 0)).reshape(KH * KW, Cin, Cout)
    b_sum = jnp.sum(b_stack, axis=0).reshape(1, Cout)

    # Layout glue: channels on the 128-lane axis.
    x_nhwc = jnp.transpose(x_nchw, (0, 2, 3, 1))               # (N, H, W, Cin)

    two_tc = _two_tensorcores_per_chip()
    bb = images_per_block or _pick_images_per_block(
        N, H, W, Cin, Cout, x_nhwc.dtype.itemsize, two_tc)
    grid = (N // bb,)
    wp = ((W + 2 + 7) // 8) * 8                                 # sublane-aligned padded width

    out_nhwc = pl.pallas_call(
        _make_kernel(bb, H, W, wp, Cin, Cout),
        out_shape=jax.ShapeDtypeStruct((N, H, W, Cout), x_nchw.dtype),
        grid_spec=pltpu.PrefetchScalarGridSpec(
            num_scalar_prefetch=0,
            grid=grid,
            in_specs=[
                pl.BlockSpec((bb, H, W, Cin), lambda n: (n, 0, 0, 0)),
                pl.BlockSpec((KH * KW, Cin, Cout), lambda n: (0, 0, 0)),
                pl.BlockSpec((1, Cout), lambda n: (0, 0)),
            ],
            out_specs=pl.BlockSpec((bb, H, W, Cout), lambda n: (n, 0, 0, 0)),
            scratch_shapes=[pltpu.VMEM((bb, H + 2, wp, Cin), x_nhwc.dtype)],
        ),
        compiler_params=pltpu.CompilerParams(
            dimension_semantics=("parallel",),
            allow_input_fusion=[True, False, False],  # let XLA fuse the NCHW->NHWC transpose
        ),
    )(x_nhwc, w_taps, b_sum)

    return jnp.transpose(out_nhwc, (0, 3, 1, 2))               # back to NCHW


def _reference(x_nchw, w_oihw_stack, b_stack):
    """Pure-JAX reference: sum of 5 independent convs (matches PyTorch forward)."""
    out = None
    for br in range(N_BRANCH):
        y = lax.conv_general_dilated(
            x_nchw, w_oihw_stack[br], window_strides=(1, 1), padding=((1, 1), (1, 1)),
            dimension_numbers=("NCHW", "OIHW", "NCHW"))
        y = y + b_stack[br][None, :, None, None]
        out = y if out is None else out + y
    return out


if __name__ == "__main__":
    # Module fixes channels at 128; batch=4 so single-TC chips run one M=256 step and
    # two-TC chips get two M=128 steps (one per TensorCore).
    N, C, H, W = 4, 128, 8, 8

    key = jax.random.PRNGKey(0)
    kx, kwk, kb = jax.random.split(key, 3)

    fan_in = C * KH * KW
    bound = 1.0 / np.sqrt(fan_in)
    x = jax.random.normal(kx, (N, C, H, W), dtype=jnp.float32)
    w_stack = jax.random.uniform(kwk, (N_BRANCH, C, C, KH, KW),
                                 minval=-bound, maxval=bound, dtype=jnp.float32)
    b_stack = jax.random.uniform(kb, (N_BRANCH, C),
                                 minval=-bound, maxval=bound, dtype=jnp.float32)

    fn = jax.jit(parallel_branches)
    out = jax.block_until_ready(fn(x, w_stack, b_stack))

    ref = jax.block_until_ready(_reference(x, w_stack, b_stack))
    np.testing.assert_allclose(np.asarray(out), np.asarray(ref), rtol=1e-4, atol=1e-4)

    print("KERNEL_OK")
</pallas_src>

<mosaic_0001>
module attributes {stable_mosaic.version = 11 : i64} {
  func.func @kernel(%arg0: i32, %arg1: memref<2x8x8x128xf32, #tpu.memory_space<vmem>>, %arg2: memref<9x128x128xf32, #tpu.memory_space<vmem>>, %arg3: memref<1x128xf32, #tpu.memory_space<vmem>>, %arg4: memref<2x8x8x128xf32, #tpu.memory_space<vmem>>, %arg5: memref<2x10x16x128xf32, #tpu.memory_space<vmem>>) attributes {dimension_semantics = [#tpu.dimension_semantics<parallel>], iteration_bounds = array<i64: 2>, scalar_prefetch = 0 : i64, scratch_operands = 1 : i64, tpu.core_type = #tpu.core_type<tc>, window_params = [{transform_indices = @transform_0, window_bounds = array<i64: 2, 8, 8, 128>}, {pipeline_mode = #tpu.pipeline_mode<synchronous>, transform_indices = @transform_1, window_bounds = array<i64: 9, 128, 128>}, {pipeline_mode = #tpu.pipeline_mode<synchronous>, transform_indices = @transform_2, window_bounds = array<i64: 1, 128>}, {transform_indices = @transform_3, window_bounds = array<i64: 2, 8, 8, 128>}]} {
    %cst = arith.constant 0.000000e+00 : f32
    %0 = vector.broadcast %cst : f32 to vector<2x1x16x128xf32>
    %c0 = arith.constant 0 : index
    %c0_0 = arith.constant 0 : index
    %c0_1 = arith.constant 0 : index
    %c0_2 = arith.constant 0 : index
    %1 = vector.load %arg5[%c0, %c0_0, %c0_1, %c0_2] : memref<2x10x16x128xf32, #tpu.memory_space<vmem>>, vector<2x1x16x128xf32>
    tpu.vector_store %arg5[%c0, %c0_0, %c0_1, %c0_2], %0 {strides = array<i32>} : memref<2x10x16x128xf32, #tpu.memory_space<vmem>>, vector<2x1x16x128xf32>,
    %c0_3 = arith.constant 0 : index
    %c9 = arith.constant 9 : index
    %c0_4 = arith.constant 0 : index
    %c0_5 = arith.constant 0 : index
    %2 = vector.load %arg5[%c0_3, %c9, %c0_4, %c0_5] : memref<2x10x16x128xf32, #tpu.memory_space<vmem>>, vector<2x1x16x128xf32>
    tpu.vector_store %arg5[%c0_3, %c9, %c0_4, %c0_5], %0 {strides = array<i32>} : memref<2x10x16x128xf32, #tpu.memory_space<vmem>>, vector<2x1x16x128xf32>,
    %cst_6 = arith.constant 0.000000e+00 : f32
    %3 = vector.broadcast %cst_6 : f32 to vector<2x10x1x128xf32>
    %c0_7 = arith.constant 0 : index
    %c0_8 = arith.constant 0 : index
    %c0_9 = arith.constant 0 : index
    %c0_10 = arith.constant 0 : index
    %4 = vector.load %arg5[%c0_7, %c0_8, %c0_9, %c0_10] : memref<2x10x16x128xf32, #tpu.memory_space<vmem>>, vector<2x10x1x128xf32>
    tpu.vector_store %arg5[%c0_7, %c0_8, %c0_9, %c0_10], %3 {strides = array<i32>} : memref<2x10x16x128xf32, #tpu.memory_space<vmem>>, vector<2x10x1x128xf32>,
    %c0_11 = arith.constant 0 : index
    %c0_12 = arith.constant 0 : index
    %c9_13 = arith.constant 9 : index
    %c0_14 = arith.constant 0 : index
    %5 = vector.load %arg5[%c0_11, %c0_12, %c9_13, %c0_14] : memref<2x10x16x128xf32, #tpu.memory_space<vmem>>, vector<2x10x1x128xf32>
    tpu.vector_store %arg5[%c0_11, %c0_12, %c9_13, %c0_14], %3 {strides = array<i32>} : memref<2x10x16x128xf32, #tpu.memory_space<vmem>>, vector<2x10x1x128xf32>,
    %c0_15 = arith.constant 0 : index
    %c0_16 = arith.constant 0 : index
    %c0_17 = arith.constant 0 : index
    %c0_18 = arith.constant 0 : index
    %6 = vector.load %arg1[%c0_15, %c0_16, %c0_17, %c0_18] : memref<2x8x8x128xf32, #tpu.memory_space<vmem>>, vector<2x8x8x128xf32>
    %c0_19 = arith.constant 0 : index
    %c1 = arith.constant 1 : index
    %c1_20 = arith.constant 1 : index
    %c0_21 = arith.constant 0 : index
    %7 = vector.load %arg5[%c0_19, %c1, %c1_20, %c0_21] : memref<2x10x16x128xf32, #tpu.memory_space<vmem>>, vector<2x8x8x128xf32>
    tpu.vector_store %arg5[%c0_19, %c1, %c1_20, %c0_21], %6 {strides = array<i32>} : memref<2x10x16x128xf32, #tpu.memory_space<vmem>>, vector<2x8x8x128xf32>,
    %cst_22 = arith.constant 0.000000e+00 : f32
    %8 = vector.broadcast %cst_22 : f32 to vector<128x128xf32>
    %c0_23 = arith.constant 0 : index
    %c0_24 = arith.constant 0 : index
    %c0_25 = arith.constant 0 : index
    %c0_26 = arith.constant 0 : index
    %9 = vector.load %arg5[%c0_23, %c0_24, %c0_25, %c0_26] : memref<2x10x16x128xf32, #tpu.memory_space<vmem>>, vector<2x8x8x128xf32>
    %10 = vector.shape_cast %9 : vector<2x8x8x128xf32> to vector<128x128xf32>
    %c0_27 = arith.constant 0 : index
    %c0_28 = arith.constant 0 : index
    %c0_29 = arith.constant 0 : index
    %11 = vector.load %arg2[%c0_27, %c0_28, %c0_29] : memref<9x128x128xf32, #tpu.memory_space<vmem>>, vector<1x128x128xf32>
    %12 = vector.shape_cast %11 : vector<1x128x128xf32> to vector<128x128xf32>
    %cst_30 = arith.constant dense<0.000000e+00> : vector<128x128xf32>
    %13 = tpu.matmul %10, %12, %cst_30 {dimension_numbers = #tpu.dot_dimension_numbers<[1], [0], [0], [1], [0, 0, 1, 1], [], []>} : vector<128x128xf32>, vector<128x128xf32>, vector<128x128xf32> -> vector<128x128xf32>
    %14 = arith.addf %8, %13 : vector<128x128xf32>
    %c0_31 = arith.constant 0 : index
    %c0_32 = arith.constant 0 : index
    %c1_33 = arith.constant 1 : index
    %c0_34 = arith.constant 0 : index
    %15 = vector.load %arg5[%c0_31, %c0_32, %c1_33, %c0_34] : memref<2x10x16x128xf32, #tpu.memory_space<vmem>>, vector<2x8x8x128xf32>
    %16 = vector.shape_cast %15 : vector<2x8x8x128xf32> to vector<128x128xf32>
    %c1_35 = arith.constant 1 : index
    %c0_36 = arith.constant 0 : index
    %c0_37 = arith.constant 0 : index
    %17 = vector.load %arg2[%c1_35, %c0_36, %c0_37] : memref<9x128x128xf32, #tpu.memory_space<vmem>>, vector<1x128x128xf32>
    %18 = vector.shape_cast %17 : vector<1x128x128xf32> to vector<128x128xf32>
    %cst_38 = arith.constant dense<0.000000e+00> : vector<128x128xf32>
    %19 = tpu.matmul %16, %18, %cst_38 {dimension_numbers = #tpu.dot_dimension_numbers<[1], [0], [0], [1], [0, 0, 1, 1], [], []>} : vector<128x128xf32>, vector<128x128xf32>, vector<128x128xf32> -> vector<128x128xf32>
    %20 = arith.addf %14, %19 : vector<128x128xf32>
    %c0_39 = arith.constant 0 : index
    %c0_40 = arith.constant 0 : index
    %c2 = arith.constant 2 : index
    %c0_41 = arith.constant 0 : index
    %21 = vector.load %arg5[%c0_39, %c0_40, %c2, %c0_41] : memref<2x10x16x128xf32, #tpu.memory_space<vmem>>, vector<2x8x8x128xf32>
    %22 = vector.shape_cast %21 : vector<2x8x8x128xf32> to vector<128x128xf32>
    %c2_42 = arith.constant 2 : index
    %c0_43 = arith.constant 0 : index
    %c0_44 = arith.constant 0 : index
    %23 = vector.load %arg2[%c2_42, %c0_43, %c0_44] : memref<9x128x128xf32, #tpu.memory_space<vmem>>, vector<1x128x128xf32>
    %24 = vector.shape_cast %23 : vector<1x128x128xf32> to vector<128x128xf32>
    %cst_45 = arith.constant dense<0.000000e+00> : vector<128x128xf32>
    %25 = tpu.matmul %22, %24, %cst_45 {dimension_numbers = #tpu.dot_dimension_numbers<[1], [0], [0], [1], [0, 0, 1, 1], [], []>} : vector<128x128xf32>, vector<128x128xf32>, vector<128x128xf32> -> vector<128x128xf32>
    %26 = arith.addf %20, %25 : vector<128x128xf32>
    %c0_46 = arith.constant 0 : index
    %c1_47 = arith.constant 1 : index
    %c0_48 = arith.constant 0 : index
    %c0_49 = arith.constant 0 : index
    %27 = vector.load %arg5[%c0_46, %c1_47, %c0_48, %c0_49] : memref<2x10x16x128xf32, #tpu.memory_space<vmem>>, vector<2x8x8x128xf32>
    %28 = vector.shape_cast %27 : vector<2x8x8x128xf32> to vector<128x128xf32>
    %c3 = arith.constant 3 : index
    %c0_50 = arith.constant 0 : index
    %c0_51 = arith.constant 0 : index
    %29 = vector.load %arg2[%c3, %c0_50, %c0_51] : memref<9x128x128xf32, #tpu.memory_space<vmem>>, vector<1x128x128xf32>
    %30 = vector.shape_cast %29 : vector<1x128x128xf32> to vector<128x128xf32>
    %cst_52 = arith.constant dense<0.000000e+00> : vector<128x128xf32>
    %31 = tpu.matmul %28, %30, %cst_52 {dimension_numbers = #tpu.dot_dimension_numbers<[1], [0], [0], [1], [0, 0, 1, 1], [], []>} : vector<128x128xf32>, vector<128x128xf32>, vector<128x128xf32> -> vector<128x128xf32>
    %32 = arith.addf %26, %31 : vector<128x128xf32>
    %c0_53 = arith.constant 0 : index
    %c1_54 = arith.constant 1 : index
    %c1_55 = arith.constant 1 : index
    %c0_56 = arith.constant 0 : index
    %33 = vector.load %arg5[%c0_53, %c1_54, %c1_55, %c0_56] : memref<2x10x16x128xf32, #tpu.memory_space<vmem>>, vector<2x8x8x128xf32>
    %34 = vector.shape_cast %33 : vector<2x8x8x128xf32> to vector<128x128xf32>
    %c4 = arith.constant 4 : index
    %c0_57 = arith.constant 0 : index
    %c0_58 = arith.constant 0 : index
    %35 = vector.load %arg2[%c4, %c0_57, %c0_58] : memref<9x128x128xf32, #tpu.memory_space<vmem>>, vector<1x128x128xf32>
    %36 = vector.shape_cast %35 : vector<1x128x128xf32> to vector<128x128xf32>
    %cst_59 = arith.constant dense<0.000000e+00> : vector<128x128xf32>
    %37 = tpu.matmul %34, %36, %cst_59 {dimension_numbers = #tpu.dot_dimension_numbers<[1], [0], [0], [1], [0, 0, 1, 1], [], []>} : vector<128x128xf32>, vector<128x128xf32>, vector<128x128xf32> -> vector<128x128xf32>
    %38 = arith.addf %32, %37 : vector<128x128xf32>
    %c0_60 = arith.constant 0 : index
    %c1_61 = arith.constant 1 : index
    %c2_62 = arith.constant 2 : index
    %c0_63 = arith.constant 0 : index
    %39 = vector.load %arg5[%c0_60, %c1_61, %c2_62, %c0_63] : memref<2x10x16x128xf32, #tpu.memory_space<vmem>>, vector<2x8x8x128xf32>
    %40 = vector.shape_cast %39 : vector<2x8x8x128xf32> to vector<128x128xf32>
    %c5 = arith.constant 5 : index
    %c0_64 = arith.constant 0 : index
    %c0_65 = arith.constant 0 : index
    %41 = vector.load %arg2[%c5, %c0_64, %c0_65] : memref<9x128x128xf32, #tpu.memory_space<vmem>>, vector<1x128x128xf32>
    %42 = vector.shape_cast %41 : vector<1x128x128xf32> to vector<128x128xf32>
    %cst_66 = arith.constant dense<0.000000e+00> : vector<128x128xf32>
    %43 = tpu.matmul %40, %42, %cst_66 {dimension_numbers = #tpu.dot_dimension_numbers<[1], [0], [0], [1], [0, 0, 1, 1], [], []>} : vector<128x128xf32>, vector<128x128xf32>, vector<128x128xf32> -> vector<128x128xf32>
    %44 = arith.addf %38, %43 : vector<128x128xf32>
    %c0_67 = arith.constant 0 : index
    %c2_68 = arith.constant 2 : index
    %c0_69 = arith.constant 0 : index
    %c0_70 = arith.constant 0 : index
    %45 = vector.load %arg5[%c0_67, %c2_68, %c0_69, %c0_70] : memref<2x10x16x128xf32, #tpu.memory_space<vmem>>, vector<2x8x8x128xf32>
    %46 = vector.shape_cast %45 : vector<2x8x8x128xf32> to vector<128x128xf32>
    %c6 = arith.constant 6 : index
    %c0_71 = arith.constant 0 : index
    %c0_72 = arith.constant 0 : index
    %47 = vector.load %arg2[%c6, %c0_71, %c0_72] : memref<9x128x128xf32, #tpu.memory_space<vmem>>, vector<1x128x128xf32>
    %48 = vector.shape_cast %47 : vector<1x128x128xf32> to vector<128x128xf32>
    %cst_73 = arith.constant dense<0.000000e+00> : vector<128x128xf32>
    %49 = tpu.matmul %46, %48, %cst_73 {dimension_numbers = #tpu.dot_dimension_numbers<[1], [0], [0], [1], [0, 0, 1, 1], [], []>} : vector<128x128xf32>, vector<128x128xf32>, vector<128x128xf32> -> vector<128x128xf32>
    %50 = arith.addf %44, %49 : vector<128x128xf32>
    %c0_74 = arith.constant 0 : index
    %c2_75 = arith.constant 2 : index
    %c1_76 = arith.constant 1 : index
    %c0_77 = arith.constant 0 : index
    %51 = vector.load %arg5[%c0_74, %c2_75, %c1_76, %c0_77] : memref<2x10x16x128xf32, #tpu.memory_space<vmem>>, vector<2x8x8x128xf32>
    %52 = vector.shape_cast %51 : vector<2x8x8x128xf32> to vector<128x128xf32>
    %c7 = arith.constant 7 : index
    %c0_78 = arith.constant 0 : index
    %c0_79 = arith.constant 0 : index
    %53 = vector.load %arg2[%c7, %c0_78, %c0_79] : memref<9x128x128xf32, #tpu.memory_space<vmem>>, vector<1x128x128xf32>
    %54 = vector.shape_cast %53 : vector<1x128x128xf32> to vector<128x128xf32>
    %cst_80 = arith.constant dense<0.000000e+00> : vector<128x128xf32>
    %55 = tpu.matmul %52, %54, %cst_80 {dimension_numbers = #tpu.dot_dimension_numbers<[1], [0], [0], [1], [0, 0, 1, 1], [], []>} : vector<128x128xf32>, vector<128x128xf32>, vector<128x128xf32> -> vector<128x128xf32>
    %56 = arith.addf %50, %55 : vector<128x128xf32>
    %c0_81 = arith.constant 0 : index
    %c2_82 = arith.constant 2 : index
    %c2_83 = arith.constant 2 : index
    %c0_84 = arith.constant 0 : index
    %57 = vector.load %arg5[%c0_81, %c2_82, %c2_83, %c0_84] : memref<2x10x16x128xf32, #tpu.memory_space<vmem>>, vector<2x8x8x128xf32>
    %58 = vector.shape_cast %57 : vector<2x8x8x128xf32> to vector<128x128xf32>
    %c8 = arith.constant 8 : index
    %c0_85 = arith.constant 0 : index
    %c0_86 = arith.constant 0 : index
    %59 = vector.load %arg2[%c8, %c0_85, %c0_86] : memref<9x128x128xf32, #tpu.memory_space<vmem>>, vector<1x128x128xf32>
    %60 = vector.shape_cast %59 : vector<1x128x128xf32> to vector<128x128xf32>
    %cst_87 = arith.constant dense<0.000000e+00> : vector<128x128xf32>
    %61 = tpu.matmul %58, %60, %cst_87 {dimension_numbers = #tpu.dot_dimension_numbers<[1], [0], [0], [1], [0, 0, 1, 1], [], []>} : vector<128x128xf32>, vector<128x128xf32>, vector<128x128xf32> -> vector<128x128xf32>
    %62 = arith.addf %56, %61 : vector<128x128xf32>
    %c0_88 = arith.constant 0 : index
    %c0_89 = arith.constant 0 : index
    %63 = vector.load %arg3[%c0_88, %c0_89] : memref<1x128xf32, #tpu.memory_space<vmem>>, vector<1x128xf32>
    %64 = vector.broadcast %63 : vector<1x128xf32> to vector<128x128xf32>
    %65 = arith.addf %62, %64 : vector<128x128xf32>
    %66 = vector.shape_cast %65 : vector<128x128xf32> to vector<2x8x8x128xf32>
    %c0_90 = arith.constant 0 : index
    %c0_91 = arith.constant 0 : index
    %c0_92 = arith.constant 0 : index
    %c0_93 = arith.constant 0 : index
    %67 = vector.load %arg4[%c0_90, %c0_91, %c0_92, %c0_93] : memref<2x8x8x128xf32, #tpu.memory_space<vmem>>, vector<2x8x8x128xf32>
    tpu.vector_store %arg4[%c0_90, %c0_91, %c0_92, %c0_93], %66 {strides = array<i32>} : memref<2x8x8x128xf32, #tpu.memory_space<vmem>>, vector<2x8x8x128xf32>,
    return
  }
  func.func @transform_0(%arg0: i32) -> (i32, i32, i32, i32) {
    %c0_i32 = arith.constant 0 : i32
    %c0_i32_0 = arith.constant 0 : i32
    %c0_i32_1 = arith.constant 0 : i32
    %c0_i32_2 = arith.constant 0 : i32
    return %arg0, %c0_i32, %c0_i32_0, %c0_i32_1 : i32, i32, i32, i32
  }
  func.func @transform_1(%arg0: i32) -> (i32, i32, i32) {
    %c0_i32 = arith.constant 0 : i32
    %c0_i32_0 = arith.constant 0 : i32
    %c0_i32_1 = arith.constant 0 : i32
    %c0_i32_2 = arith.constant 0 : i32
    return %c0_i32, %c0_i32_0, %c0_i32_1 : i32, i32, i32
  }
  func.func @transform_2(%arg0: i32) -> (i32, i32) {
    %c0_i32 = arith.constant 0 : i32
    %c0_i32_0 = arith.constant 0 : i32
    %c0_i32_1 = arith.constant 0 : i32
    return %c0_i32, %c0_i32_0 : i32, i32
  }
  func.func @transform_3(%arg0: i32) -> (i32, i32, i32, i32) {
    %c0_i32 = arith.constant 0 : i32
    %c0_i32_0 = arith.constant 0 : i32
    %c0_i32_1 = arith.constant 0 : i32
    %c0_i32_2 = arith.constant 0 : i32
    return %arg0, %c0_i32, %c0_i32_0, %c0_i32_1 : i32, i32, i32, i32
  }
}

</mosaic_0001>

<bundles_post_ra>
// kernel: parallel_branches.2
= control target key start
LH: loop header
LB: loop body
LE: loop exit
PB: predicated region body
PF: predicated region fallthrough
CT: control target
= control target key end

     0   :  { %8 = vsyncpa [#allocation4], 0  ;;  %s4546_s0 = inlined_call_operand.vmem [shape: f32[9,128,128], index: 0, kind: input, shape index: {}]   ;;  %s4547_s1 = inlined_call_operand.vmem [shape: f32[1,128], index: 1, kind: input, shape index: {}]   ;;  %s4548_s2 = inlined_call_operand.vmem [shape: f32[4,128,8,8], index: 2, kind: input, shape index: {}]   ;;  %s4549_s3 = inlined_call_operand.hbm [shape: f32[4,8,8,128], index: 3, kind: output, shape index: {}]  }
   0x1   :  { %10 = vsyncpa [#allocation4 + $0x1], 0  ;;  %s3680_s12 = smov 0   ;;  %s3682_s13 = smov 0  }
   0x2   :  { %s3684_s14 = smov 0   ;;  %s3686_s15 = smov 0  }
   0x3 LB: > { %s3701_s16 = sadd.s32 4294967295, %s3654_s15   ;;  %s2165_s17 = sadd.s32 4294967294, %s3654_s15   ;;  %s3654_s15 = sphi %s3686_s15, %s4556_s15   ;;  %s3650_s14 = sphi %s3684_s14, %s4555_s14   ;;  %s3646_s13 = sphi %s3682_s13, %s4554_s13   ;;  %s3642_s12 = sphi %s3680_s12, %s4553_s12  }
   0x4   : > { %s3705_s18 = sadd.s32 1, %s3654_s15   ;;  %s91_s19 = sadd.s32 1, %s3650_s14 }
   0x5   : > { %s88_s20 = ssub.s32 %s3654_s15, %s3705_s18  ;;  %p101_p0 = scmp.ne.s32.totalorder %s3650_s14, %s3646_s13 }
   0x6   : > { %p89_p1 = scmp.eq.s32.totalorder %s88_s20, 0  ;;  %p102_p2 = scmp.eq.s32.totalorder %s3701_s16, 1 }
   0x7   : > { %p107_p3 = scmp.ne.s32.totalorder %s3646_s13, %s3642_s12  ;;  %p108_p4 = scmp.eq.s32.totalorder %s2165_s17, 1 }
   0x8   : > { %s3716_s21 = scalar_select %p89_p1, %s3650_s14, %s91_s19  }
   0x9   : > { %p3718_p5 = por %p102_p2, %p101_p0  ;;  %p3722_p6 = por %p108_p4, %p107_p3 }
   0xa   : > { %p2168_p7 = scmp.ge.s32.totalorder %s3654_s15, 1  ;;  %p142_p8 = scmp.lt.s32.totalorder %s3654_s15, 3 }
   0xc   : > { %p143_p9 = pnand %p2168_p7, %p142_p8 }
   0xd   : > { %v2188_v0 = vld [vmem:[%s4546_s0 + $0x80] sm:$0xff] (!%p143_p9)  ;;  %v2189_v1 = vld [vmem:[%s4546_s0 + $0x88] sm:$0xff] (!%p143_p9)  ;;  %s2170_s30 = sshll.u32 (!%p143_p9), %s3701_s16, 1  ;;  %v2190_v5 = vld [vmem:[%s4546_s0 + $0x90] sm:$0xff] (!%p143_p9)  ;;  %v3656_v7 = vmov (!%p143_p9), 0.0   ;;  %s2325_s11 = sshll.u32 (!%p143_p9), %s3701_s16, 11 }
   0xe   : > { %146 = sbr.rel (%p143_p9) target bundleno = 421 (0x1a5), region = 32  ;;  %v2236_v2 = vld [vmem:[%s4546_s0 + $0x200] sm:$0xff] (!%p143_p9)  ;;  %v3738_v3 = vpack.c.bf16 (!%p143_p9), %v2189_v1, %v2188_v0  ;;  %v2237_v4 = vld [vmem:[%s4546_s0 + $0x208] sm:$0xff] (!%p143_p9)  ;;  %v2191_v6 = vld [vmem:[%s4546_s0 + $0x98] sm:$0xff] (!%p143_p9)  ;;  %253 = vst [vmem:[#allocation2] sm:$0xff] (!%p143_p9), %v3656_v7  ;;  %p3751_p10 = scmp.lt.s32.totalorder (!%p143_p9), %s2170_s30, 3 }
   0xf   : > { %254 = vst [vmem:[#allocation2 + $0x8] sm:$0xff] (!%p143_p9), %v3656_v7  ;;  %255 = vst [vmem:[#allocation2 + $0xa0] sm:$0xff] (!%p143_p9), %v3656_v7  ;;  %v3246_v8 = vpack.c.bf16 (!%p143_p9), %v2237_v4, %v2236_v2  ;;  %v3122_v9 = vpack.c.bf16 (!%p143_p9), %v2191_v6, %v2190_v5  ;;  %v2238_v10 = vld [vmem:[%s4546_s0 + $0x210] sm:$0xff] (!%p143_p9)  ;;  %v2239_v11 = vld [vmem:[%s4546_s0 + $0x218] sm:$0xff] (!%p143_p9)  ;;  %s4494_s19 = scalar_lea.hbm (!%p143_p9), %s4549_s3, %s2325_s11  ;;  %s3657_s24 = smov (!%p143_p9), [#allocation3]  }
  0x10   : > { %256 = vst [vmem:[#allocation2 + $0xa8] sm:$0xff] (!%p143_p9), %v3656_v7  ;;  %258 = vst [vmem:[#allocation2 + $0x90] sm:$0xff] (!%p143_p9), %v3656_v7  ;;  %v2192_v12 = vld [vmem:[%s4546_s0 + $0xa0] sm:$0xff] (!%p143_p9)  ;;  %3119 = vmatprep.subr.bf16.mxu1 (!%p143_p9), %v3738_v3  ;;  %v3250_v13 = vpack.c.bf16 (!%p143_p9), %v2239_v11, %v2238_v10  ;;  %v2193_v14 = vld [vmem:[%s4546_s0 + $0xa8] sm:$0xff] (!%p143_p9)  ;;  %s3596_s26 = sshll.u32 (!%p143_p9), %s3657_s24, 4  ;;  %s3597_s26 = int_to_ptr.vmem [resolvable:$false] %s3596_s26 }
  0x11   : > { %259 = vst [vmem:[#allocation2 + $0x98] sm:$0xff] (!%p143_p9), %v3656_v7  ;;  %260 = vst [vmem:[#allocation2 + $0x130] sm:$0xff] (!%p143_p9), %v3656_v7  ;;  %v2240_v15 = vld [vmem:[%s4546_s0 + $0x220] sm:$0xff] (!%p143_p9)  ;;  %v2241_v16 = vld [vmem:[%s4546_s0 + $0x228] sm:$0xff] (!%p143_p9)  ;;  %3247 = vmatprep.subr.bf16.mxu0 (!%p143_p9), %v3246_v8  ;;  %3121 = vmatpush3.bf16.msra.mxu1 (!%p143_p9), %v3738_v3  ;;  %v3126_v17 = vpack.c.bf16 (!%p143_p9), %v2193_v14, %v2192_v12  ;;  %s3598_s27 = scalar_lea.vmem (!%p143_p9), %s3597_s26, 4096 }
  0x12   : > { %261 = vst [vmem:[#allocation2 + $0x138] sm:$0xff] (!%p143_p9), %v3656_v7  ;;  %263 = vst [vmem:[#allocation2 + $0x10] sm:$0x1] (!%p143_p9), %v3656_v7  ;;  %3249 = vmatpush3.bf16.msra.mxu0 (!%p143_p9), %v3246_v8  ;;  %3123 = vmatprep.subr.bf16.mxu1 (!%p143_p9), %v3122_v9  ;;  %v3254_v18 = vpack.c.bf16 (!%p143_p9), %v2241_v16, %v2240_v15  ;;  %v2194_v19 = vld [vmem:[%s4546_s0 + $0xb0] sm:$0xff] (!%p143_p9)  ;;  %v2195_v20 = vld [vmem:[%s4546_s0 + $0xb8] sm:$0xff] (!%p143_p9) }
  0x13   : > { %264 = vst [vmem:[#allocation2 + $0x20] sm:$0x1] (!%p143_p9), %v3656_v7  ;;  %265 = vst [vmem:[#allocation2 + $0x30] sm:$0x1] (!%p143_p9), %v3656_v7  ;;  %3251 = vmatprep.subr.bf16.mxu0 (!%p143_p9), %v3250_v13  ;;  %v2242_v21 = vld [vmem:[%s4546_s0 + $0x230] sm:$0xff] (!%p143_p9)  ;;  %v2243_v22 = vld [vmem:[%s4546_s0 + $0x238] sm:$0xff] (!%p143_p9)  ;;  %v3130_v23 = vpack.c.bf16 (!%p143_p9), %v2195_v20, %v2194_v19 }
  0x14   : > { %266 = vst [vmem:[#allocation2 + $0x40] sm:$0x1] (!%p143_p9), %v3656_v7  ;;  %267 = vst [vmem:[#allocation2 + $0x50] sm:$0x1] (!%p143_p9), %v3656_v7  ;;  %v3258_v24 = vpack.c.bf16 (!%p143_p9), %v2243_v22, %v2242_v21  ;;  %v2196_v25 = vld [vmem:[%s4546_s0 + $0xc0] sm:$0xff] (!%p143_p9)  ;;  %v2197_v26 = vld [vmem:[%s4546_s0 + $0xc8] sm:$0xff] (!%p143_p9) }
  0x15   : > { %268 = vst [vmem:[#allocation2 + $0x60] sm:$0x1] %v3656_v7  ;;  %269 = vst [vmem:[#allocation2 + $0x70] sm:$0x1] %v3656_v7  ;;  %s4558_s30 = smov (!%p3751_p10, %s2170_s30), 3  ;;  %3125 = vmatpush3.bf16.msra.mxu1 %v3122_v9  ;;  %v2244_v28 = vld [vmem:[%s4546_s0 + $0x240] sm:$0xff]  ;;  %v3134_v32 = vpack.c.bf16 %v2197_v26, %v2196_v25 }
  0x16   : > { %270 = vst [vmem:[#allocation2 + $0x80] sm:$0x1] %v3656_v7  ;;  %273 = vst [vmem:[#allocation2 + $0xb0] sm:$0x1] %v3656_v7  ;;  %s2323_s6 = sshll.u32 %s4558_s30, 6  ;;  %3253 = vmatpush3.bf16.msra.mxu0 %v3250_v13  ;;  %3127 = vmatprep.subr.bf16.mxu1 %v3126_v17  ;;  %v367_v27 = vld [vmem:[#allocation2 + $0x1] sm:$0xff] }
  0x17   : > { %274 = vst [vmem:[#allocation2 + $0xc0] sm:$0x1] %v3656_v7  ;;  %275 = vst [vmem:[#allocation2 + $0xd0] sm:$0x1] %v3656_v7  ;;  %s3794_s25 = scalar_lea.vmem %s4548_s2, %s2323_s6  ;;  %3255 = vmatprep.subr.bf16.mxu0 %v3254_v18  ;;  %v2245_v29 = vld [vmem:[%s4546_s0 + $0x248] sm:$0xff]  ;;  %2646 = vmatprep.mubr.f32.mxu1 %v367_v27  ;;  %v2198_v35 = vld [vmem:[%s4546_s0 + $0xd0] sm:$0xff] }
  0x18   : > { %276 = vst [vmem:[#allocation2 + $0xe0] sm:$0x1] %v3656_v7  ;;  %277 = vst [vmem:[#allocation2 + $0xf0] sm:$0x1] %v3656_v7  ;;  %v3809_v30 = vld [vmem:[%s3794_s25] sm:$0xff]  ;;  %v3814_v31 = vld [vmem:[%s3794_s25 + $0x8] sm:$0xff]  ;;  %v3262_v34 = vpack.c.bf16 %v2245_v29, %v2244_v28 }
  0x19   : > { %278 = vst [vmem:[#allocation2 + $0x100] sm:$0x1] %v3656_v7  ;;  %279 = vst [vmem:[#allocation2 + $0x110] sm:$0x1] %v3656_v7  ;;  %3129 = vmatpush3.bf16.msra.mxu1 %v3126_v17  ;;  %2870 = vmatprep.mubr.f32.mxu0 %v3809_v30  ;;  %v3818_v33 = vld [vmem:[%s3794_s25 + $0x10] sm:$0xff]  ;;  %v2199_v36 = vld [vmem:[%s4546_s0 + $0xd8] sm:$0xff] }
  0x1a   : > { %280 = vst [vmem:[#allocation2 + $0x120] sm:$0x1] %v3656_v7  ;;  %283 = vst [vmem:[#allocation2 + $0x19] sm:$0x1] %v3656_v7  ;;  %3257 = vmatpush3.bf16.msra.mxu0 %v3254_v18  ;;  %3131 = vmatprep.subr.bf16.mxu1 %v3130_v23  ;;  %v3828_v37 = vld [vmem:[%s3794_s25 + $0x18] sm:$0xff]  ;;  %v2246_v38 = vld [vmem:[%s4546_s0 + $0x250] sm:$0xff]  ;;  %v3138_v42 = vpack.c.bf16 %v2199_v36, %v2198_v35 }
  0x1b   : > { %284 = vst [vmem:[#allocation2 + $0x29] sm:$0x1] %v3656_v7  ;;  %285 = vst [vmem:[#allocation2 + $0x39] sm:$0x1] %v3656_v7  ;;  %3259 = vmatprep.subr.bf16.mxu0 %v3258_v24  ;;  %v2247_v39 = vld [vmem:[%s4546_s0 + $0x258] sm:$0xff]  ;;  %v3838_v40 = vld [vmem:[%s3794_s25 + $0x20] sm:$0xff] }
  0x1c   : > { %286 = vst [vmem:[#allocation2 + $0x49] sm:$0x1] %v3656_v7  ;;  %287 = vst [vmem:[#allocation2 + $0x59] sm:$0x1] %v3656_v7  ;;  %v3842_v41 = vld [vmem:[%s3794_s25 + $0x28] sm:$0xff]  ;;  %v3846_v43 = vld [vmem:[%s3794_s25 + $0x30] sm:$0xff]  ;;  %v3266_v44 = vpack.c.bf16 %v2247_v39, %v2246_v38 }
  0x1d   : > { %288 = vst [vmem:[#allocation2 + $0x69] sm:$0x1] %v3656_v7  ;;  %289 = vst [vmem:[#allocation2 + $0x79] sm:$0x1] %v3656_v7  ;;  %3133 = vmatpush3.bf16.msra.mxu1 %v3130_v23  ;;  %v2200_v45 = vld [vmem:[%s4546_s0 + $0xe0] sm:$0xff]  ;;  %v2201_v46 = vld [vmem:[%s4546_s0 + $0xe8] sm:$0xff] }
  0x1e   : > { %290 = vst [vmem:[#allocation2 + $0x89] sm:$0x1] %v3656_v7  ;;  %293 = vst [vmem:[#allocation2 + $0xb9] sm:$0x1] %v3656_v7  ;;  %3261 = vmatpush3.bf16.msra.mxu0 %v3258_v24  ;;  %3135 = vmatprep.subr.bf16.mxu1 %v3134_v32  ;;  %v3856_v47 = vld [vmem:[%s3794_s25 + $0x38] sm:$0xff]  ;;  %v2248_v48 = vld [vmem:[%s4546_s0 + $0x260] sm:$0xff]  ;;  %v3142_v52 = vpack.c.bf16 %v2201_v46, %v2200_v45 }
  0x1f   : > { %294 = vst [vmem:[#allocation2 + $0xc9] sm:$0x1] %v3656_v7  ;;  %295 = vst [vmem:[#allocation2 + $0xd9] sm:$0x1] %v3656_v7  ;;  %3263 = vmatprep.subr.bf16.mxu0 %v3262_v34  ;;  %v2249_v49 = vld [vmem:[%s4546_s0 + $0x268] sm:$0xff]  ;;  %v3866_v50 = vld [vmem:[%s3794_s25 + $0x40] sm:$0xff] }
  0x20   : > { %296 = vst [vmem:[#allocation2 + $0xe9] sm:$0x1] %v3656_v7  ;;  %297 = vst [vmem:[#allocation2 + $0xf9] sm:$0x1] %v3656_v7  ;;  %v3870_v51 = vld [vmem:[%s3794_s25 + $0x48] sm:$0xff]  ;;  %v3874_v53 = vld [vmem:[%s3794_s25 + $0x50] sm:$0xff]  ;;  %v3270_v54 = vpack.c.bf16 %v2249_v49, %v2248_v48 }
  0x21   : > { %298 = vst [vmem:[#allocation2 + $0x109] sm:$0x1] %v3656_v7  ;;  %299 = vst [vmem:[#allocation2 + $0x119] sm:$0x1] %v3656_v7  ;;  %3137 = vmatpush3.bf16.msra.mxu1 %v3134_v32  ;;  %v2202_v55 = vld [vmem:[%s4546_s0 + $0xf0] sm:$0xff]  ;;  %v2203_v56 = vld [vmem:[%s4546_s0 + $0xf8] sm:$0xff] }
  0x22   : > { %300 = vst [vmem:[#allocation2 + $0x129] sm:$0x1] %v3656_v7  ;;  %262 = vst [vmem:[#allocation2] sm:$0x1] %v3656_v7  ;;  %3265 = vmatpush3.bf16.msra.mxu0 %v3262_v34  ;;  %3139 = vmatprep.subr.bf16.mxu1 %v3138_v42  ;;  %v3884_v57 = vld [vmem:[%s3794_s25 + $0x58] sm:$0xff]  ;;  %v2250_v58 = vld [vmem:[%s4546_s0 + $0x270] sm:$0xff]  ;;  %v3146_v62 = vpack.c.bf16 %v2203_v56, %v2202_v55 }
  0x23   : > { %282 = vst [vmem:[#allocation2 + $0x9] sm:$0x1] %v3656_v7  ;;  %271 = vst [vmem:[#allocation2 + $0x90] sm:$0x1] %v3656_v7  ;;  %3267 = vmatprep.subr.bf16.mxu0 %v3266_v44  ;;  %v2251_v59 = vld [vmem:[%s4546_s0 + $0x278] sm:$0xff]  ;;  %v3894_v60 = vld [vmem:[%s3794_s25 + $0x60] sm:$0xff] }
  0x24   : > { %272 = vst [vmem:[#allocation2 + $0xa0] sm:$0x1] %v3656_v7  ;;  %281 = vst [vmem:[#allocation2 + $0x130] sm:$0x1] %v3656_v7  ;;  %v3898_v61 = vld [vmem:[%s3794_s25 + $0x68] sm:$0xff]  ;;  %v3902_v63 = vld [vmem:[%s3794_s25 + $0x70] sm:$0xff]  ;;  %v3274_v0 = vpack.c.bf16 %v2251_v59, %v2250_v58 }
  0x25   : > { %291 = vst [vmem:[#allocation2 + $0x99] sm:$0x1] %v3656_v7  ;;  %292 = vst [vmem:[#allocation2 + $0xa9] sm:$0x1] %v3656_v7  ;;  %3141 = vmatpush3.bf16.msra.mxu1 %v3138_v42  ;;  %v351_v1 = vld [vmem:[%s4546_s0] sm:$0xff]  ;;  %v352_v2 = vld [vmem:[%s4546_s0 + $0x8] sm:$0xff] }
  0x26   : > { %301 = vst [vmem:[#allocation2 + $0x139] sm:$0x1] %v3656_v7  ;;  %319 = vst [vmem:[#allocation2 + $0x11] sm:$0xff] %v3809_v30  ;;  %3269 = vmatpush3.bf16.msra.mxu0 %v3266_v44  ;;  %3143 = vmatprep.subr.bf16.mxu1 %v3142_v52  ;;  %v3912_v3 = vld [vmem:[%s3794_s25 + $0x78] sm:$0xff]  ;;  %v2252_v4 = vld [vmem:[%s4546_s0 + $0x280] sm:$0xff]  ;;  %v3150_v6 = vpack.c.bf16 %v352_v2, %v351_v1  ;;  %s164_s6 = sand.u32 1, %s3646_s13  }
  0x27   : > { %320 = vst [vmem:[#allocation2 + $0x21] sm:$0xff] %v3814_v31  ;;  %321 = vst [vmem:[#allocation2 + $0x31] sm:$0xff] %v3818_v33  ;;  %3271 = vmatprep.subr.bf16.mxu0 %v3270_v54  ;;  %v2253_v5 = vld [vmem:[%s4546_s0 + $0x288] sm:$0xff]  ;;  %v353_v8 = vld [vmem:[%s4546_s0 + $0x10] sm:$0xff]  ;;  %s2169_s7 = sshll.u32 %s164_s6, 7  ;;  %s4505_s20 = scalar_lea.sflag [#allocation4], %s164_s6 }
  0x28   : > { %322 = vst [vmem:[#allocation2 + $0x41] sm:$0xff] %v3828_v37  ;;  %323 = vst [vmem:[#allocation2 + $0x51] sm:$0xff] %v3838_v40  ;;  %v3278_v7 = vpack.c.bf16 %v2253_v5, %v2252_v4  ;;  %v354_v9 = vld [vmem:[%s4546_s0 + $0x18] sm:$0xff]  ;;  %v2254_v10 = vld [vmem:[%s4546_s0 + $0x290] sm:$0xff]  ;;  %s4459_s9 = scalar_lea.vmem [#allocation3], %s2169_s7 }
  0x29   : > { %324 = vst [vmem:[#allocation2 + $0x61] sm:$0xff] %v3842_v41  ;;  %325 = vst [vmem:[#allocation2 + $0x71] sm:$0xff] %v3846_v43  ;;  %3145 = vmatpush3.bf16.msra.mxu1 %v3142_v52  ;;  %v2255_v11 = vld [vmem:[%s4546_s0 + $0x298] sm:$0xff]  ;;  %v3154_v12 = vpack.c.bf16 %v354_v9, %v353_v8  ;;  %v355_v14 = vld [vmem:[%s4546_s0 + $0x20] sm:$0xff]  ;;  %s2103_s17 = sshll.u32 %s4459_s9, 4  ;;  %s4496_s17 = int_to_ptr.vmem [resolvable:$true] %s2103_s17 }
  0x2a   : > { %326 = vst [vmem:[#allocation2 + $0x81] sm:$0xff] %v3856_v47  ;;  %327 = vst [vmem:[#allocation2 + $0xb1] sm:$0xff] %v3866_v50  ;;  %3273 = vmatpush3.bf16.msra.mxu0 %v3270_v54  ;;  %3147 = vmatprep.subr.bf16.mxu1 %v3146_v62  ;;  %v3282_v13 = vpack.c.bf16 %v2255_v11, %v2254_v10  ;;  %v356_v15 = vld [vmem:[%s4546_s0 + $0x28] sm:$0xff]  ;;  %v2256_v16 = vld [vmem:[%s4546_s0 + $0x2a0] sm:$0xff]  ;;  %s3592_s30 = scalar_lea.vmem %s4496_s17, 2048  ;;  %p3599_p0 = scmp.lt.s32.totalorder %s4496_s17, %s3597_s26 }
  0x2b   : > { %328 = vst [vmem:[#allocation2 + $0xc1] sm:$0xff] %v3870_v51  ;;  %329 = vst [vmem:[#allocation2 + $0xd1] sm:$0xff] %v3874_v53  ;;  %3275 = vmatprep.subr.bf16.mxu0 %v3274_v0  ;;  %v2257_v17 = vld [vmem:[%s4546_s0 + $0x2a8] sm:$0xff]  ;;  %v3158_v18 = vpack.c.bf16 %v356_v15, %v355_v14  ;;  %v357_v20 = vld [vmem:[%s4546_s0 + $0x30] sm:$0xff]  ;;  %p3593_p11 = scmp.ne.s32.totalorder %s4496_s17, %s3592_s30  ;;  %p3600_p1 = scmp.lt.s32.totalorder %s3598_s27, %s3592_s30 }
  0x2c   : > { %330 = vst [vmem:[#allocation2 + $0xe1] sm:$0xff] %v3884_v57  ;;  %331 = vst [vmem:[#allocation2 + $0xf1] sm:$0xff] %v3894_v60  ;;  %v3286_v19 = vpack.c.bf16 %v2257_v17, %v2256_v16  ;;  %v358_v21 = vld [vmem:[%s4546_s0 + $0x38] sm:$0xff]  ;;  %v2258_v22 = vld [vmem:[%s4546_s0 + $0x2b0] sm:$0xff] }
  0x2d   : > { %332 = vst [vmem:[#allocation2 + $0x101] sm:$0xff] %v3898_v61  ;;  %333 = vst [vmem:[#allocation2 + $0x111] sm:$0xff] %v3902_v63  ;;  %3149 = vmatpush3.bf16.msra.mxu1 %v3146_v62  ;;  %v2259_v23 = vld [vmem:[%s4546_s0 + $0x2b8] sm:$0xff]  ;;  %v3162_v24 = vpack.c.bf16 %v358_v21, %v357_v20  ;;  %v359_v26 = vld [vmem:[%s4546_s0 + $0x40] sm:$0xff]  ;;  %p3594_p12 = pnand %p3593_p11, %p3718_p5  ;;  %p3601_p2 = por %p3600_p1, %p3599_p0 }
  0x2e   : > { %334 = vst [vmem:[#allocation2 + $0x121] sm:$0xff] %v3912_v3  ;;  %3277 = vmatpush3.bf16.msra.mxu0 %v3274_v0  ;;  %3151 = vmatprep.subr.bf16.mxu1 %v3150_v6  ;;  %v3290_v25 = vpack.c.bf16 %v2259_v23, %v2258_v22  ;;  %v360_v27 = vld [vmem:[%s4546_s0 + $0x48] sm:$0xff]  ;;  %v2260_v28 = vld [vmem:[%s4546_s0 + $0x2c0] sm:$0xff]  ;;  %v361_v35 = vld [vmem:[%s4546_s0 + $0x50] sm:$0xff] }
  0x2f   : > { %3279 = vmatprep.subr.bf16.mxu0 %v3278_v7  ;;  %v2261_v29 = vld [vmem:[%s4546_s0 + $0x2c8] sm:$0xff]  ;;  %v3166_v32 = vpack.c.bf16 %v360_v27, %v359_v26  ;;  %v362_v36 = vld [vmem:[%s4546_s0 + $0x58] sm:$0xff]  ;;  %v2262_v38 = vld [vmem:[%s4546_s0 + $0x2d0] sm:$0xff]  ;;  %p3595_p13 = pneg %p3594_p12 }
  0x30   : > { %2647 = vmatmul.mubr.f32.vlgmr.msra.gmra.mrb[0].mxu1 %v3809_v30  ;;  %v375_v30 = vld [vmem:[#allocation2 + $0xa1] sm:$0xff]  ;;  %v3294_v34 = vpack.c.bf16 %v2261_v29, %v2260_v28  ;;  %v2263_v39 = vld [vmem:[%s4546_s0 + $0x2d8] sm:$0xff]  ;;  %v3170_v42 = vpack.c.bf16 %v362_v36, %v361_v35  ;;  %v365_v54 = vld [vmem:[%s4546_s0 + $0x70] sm:$0xff] }
  0x31   : > { %2871 = vmatmul.mubr.f32.vlgmr.msra.gmra.mrb[0].mxu0 %v3814_v31  ;;  %3153 = vmatpush3.bf16.msra.mxu1 %v3150_v6  ;;  %v3298_v44 = vpack.c.bf16 %v2263_v39, %v2262_v38  ;;  %v363_v45 = vld [vmem:[%s4546_s0 + $0x60] sm:$0xff]  ;;  %v364_v46 = vld [vmem:[%s4546_s0 + $0x68] sm:$0xff]  ;;  %v366_v55 = vld [vmem:[%s4546_s0 + $0x78] sm:$0xff]  ;;  %p3602_p3 = pnand %p3601_p2, %p3595_p13 }
  0x32   : > { %3281 = vmatpush3.bf16.msra.mxu0 %v3278_v7  ;;  %2649 = vmatprep.mubr.f32.mxu1 %v3814_v31  ;;  %v2264_v48 = vld [vmem:[%s4546_s0 + $0x2e0] sm:$0xff]  ;;  %v2265_v49 = vld [vmem:[%s4546_s0 + $0x2e8] sm:$0xff]  ;;  %v2266_v56 = vld [vmem:[%s4546_s0 + $0x2f0] sm:$0xff]  ;;  %v3178_v59 = vpack.c.bf16 %v366_v55, %v365_v54 }
  0x33   : > { %2873 = vmatprep.mubr.f32.mxu0 %v3818_v33  ;;  %3155 = vmatprep.subr.bf16.mxu1 %v3154_v12  ;;  %v3302_v52 = vpack.c.bf16 %v2265_v49, %v2264_v48  ;;  %v2267_v58 = vld [vmem:[%s4546_s0 + $0x2f8] sm:$0xff]  ;;  %v2204_v0 = vld [vmem:[%s4546_s0 + $0x100] sm:$0xff]  ;;  %v2205_v1 = vld [vmem:[%s4546_s0 + $0x108] sm:$0xff] }
  0x34   : > { %2650 = vmatmul.mubr.f32.gmra.mrb[2].mxu1 %v3818_v33  ;;  %3283 = vmatprep.subr.bf16.mxu0 %v3282_v13  ;;  %v3306_v62 = vpack.c.bf16 %v2267_v58, %v2266_v56  ;;  %v2268_v2 = vld [vmem:[%s4546_s0 + $0x300] sm:$0xff]  ;;  %v2269_v4 = vld [vmem:[%s4546_s0 + $0x308] sm:$0xff]  ;;  %v3182_v6 = vpack.c.bf16 %v2205_v1, %v2204_v0  ;;  %v4045_v7 = vld [vmem:[#allocation2 + $0x12] sm:$0xff] }
  0x35   : > { %2874 = vmatmul.mubr.f32.gmra.mrb[2].mxu0 %v3828_v37  ;;  %3157 = vmatpush3.bf16.msra.mxu1 %v3154_v12  ;;  %v335_v5 = vld [vmem:[#allocation2] sm:$0xff]  ;;  %v3310_v8 = vpack.c.bf16 %v2269_v4, %v2268_v2  ;;  %v2206_v9 = vld [vmem:[%s4546_s0 + $0x110] sm:$0xff]  ;;  %v2207_v10 = vld [vmem:[%s4546_s0 + $0x118] sm:$0xff] }
  0x36   : > { %3285 = vmatpush3.bf16.msra.mxu0 %v3282_v13  ;;  %2652 = vmatprep.mubr.f32.mxu1 %v3828_v37  ;;  %v4054_v11 = vld [vmem:[#allocation2 + $0x10] sm:$0xff]  ;;  %v2271_v13 = vld [vmem:[%s4546_s0 + $0x318] sm:$0xff]  ;;  %v4062_v14 = vld [vmem:[#allocation2 + $0x22] sm:$0xff]  ;;  %v3186_v16 = vpack.c.bf16 %v2207_v10, %v2206_v9 }
  0x37   : > { %2876 = vmatprep.mubr.f32.mxu0 %v3838_v40  ;;  %3159 = vmatprep.subr.bf16.mxu1 %v3158_v18  ;;  %v2270_v12 = vld [vmem:[%s4546_s0 + $0x310] sm:$0xff]  ;;  %v4065_v15 = vld [vmem:[#allocation2 + $0x20] sm:$0xff]  ;;  %v2209_v20 = vld [vmem:[%s4546_s0 + $0x128] sm:$0xff] }
  0x38   : > { %2653 = vmatmul.mubr.f32.gmra.mrb[4].mxu1 %v3838_v40  ;;  %3287 = vmatprep.subr.bf16.mxu0 %v3286_v19  ;;  %v4068_v17 = vld [vmem:[#allocation2 + $0x32] sm:$0xff]  ;;  %v2272_v22 = vld [vmem:[%s4546_s0 + $0x320] sm:$0xff]  ;;  %v2273_v23 = vld [vmem:[%s4546_s0 + $0x328] sm:$0xff] }
  0x39   : > { %2877 = vmatmul.mubr.f32.gmra.mrb[4].mxu0 %v3842_v41  ;;  %3161 = vmatpush3.bf16.msra.mxu1 %v3158_v18  ;;  %v3314_v18 = vpack.c.bf16 %v2271_v13, %v2270_v12  ;;  %v4077_v21 = vld [vmem:[#allocation2 + $0x30] sm:$0xff]  ;;  %v3318_v28 = vpack.c.bf16 %v2273_v23, %v2272_v22  ;;  %v2275_v35 = vld [vmem:[%s4546_s0 + $0x338] sm:$0xff]  ;;  %v4110_v36 = vld [vmem:[#allocation2 + $0x62] sm:$0xff] }
  0x3a   : > { %3289 = vmatpush3.bf16.msra.mxu0 %v3286_v19  ;;  %2655 = vmatprep.mubr.f32.mxu1 %v3842_v41  ;;  %v2208_v19 = vld [vmem:[%s4546_s0 + $0x120] sm:$0xff]  ;;  %v4092_v27 = vld [vmem:[#allocation2 + $0x52] sm:$0xff]  ;;  %v2217_v12 = vld [vmem:[%s4546_s0 + $0x168] sm:$0xff] }
  0x3b   : > { %2879 = vmatprep.mubr.f32.mxu0 %v3846_v43  ;;  %3163 = vmatprep.subr.bf16.mxu1 %v3162_v24  ;;  %v3190_v26 = vpack.c.bf16 %v2209_v20, %v2208_v19  ;;  %v2210_v29 = vld [vmem:[%s4546_s0 + $0x130] sm:$0xff]  ;;  %v4113_v38 = vld [vmem:[#allocation2 + $0x60] sm:$0xff]  ;;  %v2279_v2 = vld [vmem:[%s4546_s0 + $0x358] sm:$0xff] }
  0x3c   : > { %2656 = vmatmul.mubr.f32.gmra.mrb[6].mxu1 %v3846_v43  ;;  %3291 = vmatprep.subr.bf16.mxu0 %v3290_v25  ;;  %v4125_v48 = vld [vmem:[#allocation2 + $0x70] sm:$0xff]  ;;  %v2276_v49 = vld [vmem:[%s4546_s0 + $0x340] sm:$0xff] }
  0x3d   : > { %2880 = vmatmul.mubr.f32.gmra.mrb[6].mxu0 %v3856_v47  ;;  %3165 = vmatpush3.bf16.msra.mxu1 %v3162_v24  ;;  %v4086_v24 = vld [vmem:[#allocation2 + $0x42] sm:$0xff]  ;;  %v4138_v56 = vld [vmem:[#allocation2 + $0xb2] sm:$0xff] }
  0x3e   : > { %3293 = vmatpush3.bf16.msra.mxu0 %v3290_v25  ;;  %2658 = vmatprep.mubr.f32.mxu1 %v375_v30  ;;  %v4089_v25 = vld [vmem:[#allocation2 + $0x40] sm:$0xff]  ;;  %v2211_v30 = vld [vmem:[%s4546_s0 + $0x138] sm:$0xff]  ;;  %v4147_v0 = vld [vmem:[#allocation2 + $0xb0] sm:$0xff] }
  0x3f   : > { %2882 = vmatprep.mubr.f32.mxu0 %v3866_v50  ;;  %3167 = vmatprep.subr.bf16.mxu1 %v3166_v32  ;;  %v3194_v39 = vpack.c.bf16 %v2211_v30, %v2210_v29  ;;  %v343_v54 = vld [vmem:[#allocation2 + $0xa0] sm:$0xff]  ;;  %v2278_v1 = vld [vmem:[%s4546_s0 + $0x350] sm:$0xff]  ;;  %v2219_v29 = vld [vmem:[%s4546_s0 + $0x178] sm:$0xff] }
  0x40   : > { %2659 = vmatmul.mubr.f32.gmra.mrb[8].mxu1 %v3866_v50  ;;  %3295 = vmatprep.subr.bf16.mxu0 %v3294_v34  ;;  %v3174_v50 = vpack.c.bf16 %v364_v46, %v363_v45  ;;  %v2212_v45 = vld [vmem:[%s4546_s0 + $0x140] sm:$0xff]  ;;  %v2213_v46 = vld [vmem:[%s4546_s0 + $0x148] sm:$0xff]  ;;  %v3330_v9 = vpack.c.bf16 %v2279_v2, %v2278_v1  ;;  %v4170_v13 = vld [vmem:[#allocation2 + $0xd0] sm:$0xff] }
  0x41   : > { %2883 = vmatmul.mubr.f32.gmra.mrb[8].mxu0 %v3870_v51  ;;  %3169 = vmatpush3.bf16.msra.mxu1 %v3166_v32  ;;  %v4101_v32 = vld [vmem:[#allocation2 + $0x50] sm:$0xff]  ;;  %v3198_v55 = vpack.c.bf16 %v2213_v46, %v2212_v45  ;;  %v4155_v4 = vld [vmem:[#allocation2 + $0xc2] sm:$0xff] }
  0x42   : > { %3297 = vmatpush3.bf16.msra.mxu0 %v3294_v34  ;;  %2661 = vmatprep.mubr.f32.mxu1 %v3870_v51  ;;  %v2274_v34 = vld [vmem:[%s4546_s0 + $0x330] sm:$0xff]  ;;  %v2216_v10 = vld [vmem:[%s4546_s0 + $0x160] sm:$0xff] }
  0x43   : > { %2885 = vmatprep.mubr.f32.mxu0 %v3874_v53  ;;  %3171 = vmatprep.subr.bf16.mxu1 %v3170_v42  ;;  %v4179_v19 = vld [vmem:[#allocation2 + $0xe2] sm:$0xff]  ;;  %v3206_v22 = vpack.c.bf16 %v2217_v12, %v2216_v10  ;;  %v4185_v23 = vld [vmem:[#allocation2 + $0xf2] sm:$0xff] }
  0x44   : > { %2662 = vmatmul.mubr.f32.gmra.mrb[10].mxu1 %v3874_v53  ;;  %3299 = vmatprep.subr.bf16.mxu0 %v3298_v44  ;;  %v4182_v20 = vld [vmem:[#allocation2 + $0xe0] sm:$0xff]  ;;  %v4194_v30 = vld [vmem:[#allocation2 + $0xf0] sm:$0xff]  ;;  %v2223_v10 = vld [vmem:[%s4546_s0 + $0x198] sm:$0xff] }
  0x45   : > { %2886 = vmatmul.mubr.f32.gmra.mrb[10].mxu0 %v3884_v57  ;;  %3173 = vmatpush3.bf16.msra.mxu1 %v3170_v42  ;;  %v4116_v42 = vld [vmem:[#allocation2 + $0x72] sm:$0xff]  ;;  %v690_v1 = vld [vmem:[#allocation2 + $0x2] sm:$0xff] }
  0x46   : > { %3301 = vmatpush3.bf16.msra.mxu0 %v3298_v44  ;;  %2664 = vmatprep.mubr.f32.mxu1 %v3884_v57  ;;  %v3322_v44 = vpack.c.bf16 %v2275_v35, %v2274_v34  ;;  %v2282_v34 = vld [vmem:[%s4546_s0 + $0x370] sm:$0xff]  ;;  %v2283_v35 = vld [vmem:[%s4546_s0 + $0x378] sm:$0xff] }
  0x47   : > { %2888 = vmatprep.mubr.f32.mxu0 %v3894_v60  ;;  %3175 = vmatprep.subr.bf16.mxu1 %v3174_v50  ;;  %v4209_v46 = vld [vmem:[#allocation2 + $0x112] sm:$0xff] }
  0x48   : > { %2665 = vmatmul.mubr.f32.gmra.mrb[12].mxu1 %v3894_v60  ;;  %3303 = vmatprep.subr.bf16.mxu0 %v3302_v52  ;;  %v2286_v12 = vld [vmem:[%s4546_s0 + $0x390] sm:$0xff] }
  0x49   : > { %2889 = vmatmul.mubr.f32.gmra.mrb[12].mxu0 %v3898_v61  ;;  %3177 = vmatpush3.bf16.msra.mxu1 %v3174_v50  ;;  %v2277_v50 = vld [vmem:[%s4546_s0 + $0x348] sm:$0xff] }
  0x4a   : > { %3305 = vmatpush3.bf16.msra.mxu0 %v3302_v52  ;;  %2667 = vmatprep.mubr.f32.mxu1 %v3898_v61  ;;  %v4134_v52 = vld [vmem:[#allocation2 + $0x82] sm:$0xff]  ;;  %v3326_v58 = vpack.c.bf16 %v2277_v50, %v2276_v49  ;;  %v3338_v49 = vpack.c.bf16 %v2283_v35, %v2282_v34 }
  0x4b   : > { %2891 = vmatprep.mubr.f32.mxu0 %v3902_v63  ;;  %3179 = vmatprep.subr.bf16.mxu1 %v3178_v59  ;;  %v2220_v50 = vld [vmem:[%s4546_s0 + $0x180] sm:$0xff] }
  0x4c   : > { %2668 = vmatmul.mubr.f32.gmra.mrb[14].mxu1 %v3902_v63  ;;  %3307 = vmatprep.subr.bf16.mxu0 %v3306_v62 }
  0x4d   : > { %2892 = vmatmul.mubr.f32.gmra.mrb[14].mxu0 %v3912_v3  ;;  %3181 = vmatpush3.bf16.msra.mxu1 %v3178_v59  ;;  %v2214_v59 = vld [vmem:[%s4546_s0 + $0x150] sm:$0xff] }
  0x4e   : > { %3309 = vmatpush3.bf16.msra.mxu0 %v3306_v62  ;;  %2702 = vmatprep.mubr.f32.mxu1 %v335_v5  ;;  %v2215_v62 = vld [vmem:[%s4546_s0 + $0x158] sm:$0xff]  ;;  %v4158_v5 = vld [vmem:[#allocation2 + $0xc0] sm:$0xff] }
  0x4f   : > { %2926 = vmatprep.mubr.f32.mxu0 %v4045_v7  ;;  %3183 = vmatprep.subr.bf16.mxu1 %v3182_v6 }
  0x50   : > { %2703 = vmatmul.mubr.f32.vlgmr.msra.gmra.mrb[0].mxu1 %v4054_v11  ;;  %3311 = vmatprep.subr.bf16.mxu0 %v3310_v8 }
  0x51   : > { %2927 = vmatmul.mubr.f32.vlgmr.msra.gmra.mrb[0].mxu0 %v4062_v14  ;;  %3185 = vmatpush3.bf16.msra.mxu1 %v3182_v6  ;;  %v3202_v6 = vpack.c.bf16 %v2215_v62, %v2214_v59  ;;  %v2285_v59 = vld [vmem:[%s4546_s0 + $0x388] sm:$0xff] }
  0x52   : > { %3313 = vmatpush3.bf16.msra.mxu0 %v3310_v8  ;;  %2705 = vmatprep.mubr.f32.mxu1 %v4065_v15  ;;  %v4161_v8 = vld [vmem:[#allocation2 + $0xd2] sm:$0xff]  ;;  %v4227_v62 = vld [vmem:[#allocation2 + $0x122] sm:$0xff] }
  0x53   : > { %2929 = vmatprep.mubr.f32.mxu0 %v4068_v17  ;;  %3187 = vmatprep.subr.bf16.mxu1 %v3186_v16 }
  0x54   : > { %2706 = vmatmul.mubr.f32.gmra.mrb[2].mxu1 %v4077_v21  ;;  %3315 = vmatprep.subr.bf16.mxu0 %v3314_v18 }
  0x55   : > { %2930 = vmatmul.mubr.f32.gmra.mrb[2].mxu0 %v4086_v24  ;;  %3189 = vmatpush3.bf16.msra.mxu1 %v3186_v16  ;;  %v2280_v16 = vld [vmem:[%s4546_s0 + $0x360] sm:$0xff] }
  0x56   : > { %3317 = vmatpush3.bf16.msra.mxu0 %v3314_v18  ;;  %2708 = vmatprep.mubr.f32.mxu1 %v4089_v25  ;;  %v2281_v18 = vld [vmem:[%s4546_s0 + $0x368] sm:$0xff] }
  0x57   : > { %2932 = vmatprep.mubr.f32.mxu0 %v4092_v27  ;;  %3191 = vmatprep.subr.bf16.mxu1 %v3190_v26 }
  0x58   : > { %2709 = vmatmul.mubr.f32.gmra.mrb[4].mxu1 %v4101_v32  ;;  %3319 = vmatprep.subr.bf16.mxu0 %v3318_v28 }
  0x59   : > { %2933 = vmatmul.mubr.f32.gmra.mrb[4].mxu0 %v4110_v36  ;;  %3193 = vmatpush3.bf16.msra.mxu1 %v3190_v26  ;;  %v3334_v26 = vpack.c.bf16 %v2281_v18, %v2280_v16  ;;  %v2287_v16 = vld [vmem:[%s4546_s0 + $0x398] sm:$0xff] }
  0x5a   : > { %3321 = vmatpush3.bf16.msra.mxu0 %v3318_v28  ;;  %2711 = vmatprep.mubr.f32.mxu1 %v4113_v38  ;;  %v2218_v28 = vld [vmem:[%s4546_s0 + $0x170] sm:$0xff] }
  0x5b   : > { %2935 = vmatprep.mubr.f32.mxu0 %v4116_v42  ;;  %3195 = vmatprep.subr.bf16.mxu1 %v3194_v39  ;;  %v3210_v45 = vpack.c.bf16 %v2219_v29, %v2218_v28  ;;  %v2225_v28 = vld [vmem:[%s4546_s0 + $0x1a8] sm:$0xff]  ;;  %v2288_v29 = vld [vmem:[%s4546_s0 + $0x3a0] sm:$0xff] }
  0x5c   : > { %2712 = vmatmul.mubr.f32.gmra.mrb[6].mxu1 %v4125_v48  ;;  %3323 = vmatprep.subr.bf16.mxu0 %v3322_v44 }
  0x5d   : > { %2936 = vmatmul.mubr.f32.gmra.mrb[6].mxu0 %v4134_v52  ;;  %3197 = vmatpush3.bf16.msra.mxu1 %v3194_v39  ;;  %v4203_v39 = vld [vmem:[#allocation2 + $0x102] sm:$0xff] }
  0x5e   : > { %3325 = vmatpush3.bf16.msra.mxu0 %v3322_v44  ;;  %2714 = vmatprep.mubr.f32.mxu1 %v343_v54  ;;  %v4206_v44 = vld [vmem:[#allocation2 + $0x100] sm:$0xff]  ;;  %v2221_v54 = vld [vmem:[%s4546_s0 + $0x188] sm:$0xff] }
  0x5f   : > { %2938 = vmatprep.mubr.f32.mxu0 %v4138_v56  ;;  %3199 = vmatprep.subr.bf16.mxu1 %v3198_v55  ;;  %v3214_v2 = vpack.c.bf16 %v2221_v54, %v2220_v50  ;;  %v2290_v50 = vld [vmem:[%s4546_s0 + $0x3b0] sm:$0xff]  ;;  %v2291_v54 = vld [vmem:[%s4546_s0 + $0x3b8] sm:$0xff] }
  0x60   : > { %2715 = vmatmul.mubr.f32.gmra.mrb[8].mxu1 %v4147_v0  ;;  %3327 = vmatprep.subr.bf16.mxu0 %v3326_v58 }
  0x61   : > { %2939 = vmatmul.mubr.f32.gmra.mrb[8].mxu0 %v4155_v4  ;;  %3201 = vmatpush3.bf16.msra.mxu1 %v3198_v55  ;;  %v4218_v55 = vld [vmem:[#allocation2 + $0x110] sm:$0xff] }
  0x62   : > { %3329 = vmatpush3.bf16.msra.mxu0 %v3326_v58  ;;  %2717 = vmatprep.mubr.f32.mxu1 %v4158_v5  ;;  %v2284_v58 = vld [vmem:[%s4546_s0 + $0x380] sm:$0xff] }
  0x63   : > { %2941 = vmatprep.mubr.f32.mxu0 %v4161_v8  ;;  %3203 = vmatprep.subr.bf16.mxu1 %v3202_v6 }
  0x64   : > { %2718 = vmatmul.mubr.f32.gmra.mrb[10].mxu1 %v4170_v13  ;;  %3331 = vmatprep.subr.bf16.mxu0 %v3330_v9 }
  0x65   : > { %2942 = vmatmul.mubr.f32.gmra.mrb[10].mxu0 %v4179_v19  ;;  %3205 = vmatpush3.bf16.msra.mxu1 %v3202_v6  ;;  %v3342_v6 = vpack.c.bf16 %v2285_v59, %v2284_v58  ;;  %v4278_v59 = vld [vmem:[#allocation2 + $0x80] sm:$0xff] }
  0x66   : > { %3333 = vmatpush3.bf16.msra.mxu0 %v3330_v9  ;;  %2720 = vmatprep.mubr.f32.mxu1 %v4182_v20  ;;  %v2222_v9 = vld [vmem:[%s4546_s0 + $0x190] sm:$0xff] }
  0x67   : > { %2944 = vmatprep.mubr.f32.mxu0 %v4185_v23  ;;  %3207 = vmatprep.subr.bf16.mxu1 %v3206_v22  ;;  %v3218_v18 = vpack.c.bf16 %v2223_v10, %v2222_v9  ;;  %v2292_v9 = vld [vmem:[%s4546_s0 + $0x3c0] sm:$0xff]  ;;  %v2293_v10 = vld [vmem:[%s4546_s0 + $0x3c8] sm:$0xff] }
  0x68   : > { %2721 = vmatmul.mubr.f32.gmra.mrb[12].mxu1 %v4194_v30  ;;  %3335 = vmatprep.subr.bf16.mxu0 %v3334_v26 }
  0x69   : > { %2945 = vmatmul.mubr.f32.gmra.mrb[12].mxu0 %v4203_v39  ;;  %3209 = vmatpush3.bf16.msra.mxu1 %v3206_v22  ;;  %v3346_v22 = vpack.c.bf16 %v2287_v16, %v2286_v12  ;;  %v1474_v12 = vld [vmem:[#allocation2 + $0x90] sm:$0xff]  ;;  %v698_v16 = vld [vmem:[#allocation2 + $0xa2] sm:$0xff] }
  0x6a   : > { %3337 = vmatpush3.bf16.msra.mxu0 %v3334_v26  ;;  %2723 = vmatprep.mubr.f32.mxu1 %v4206_v44  ;;  %v2224_v26 = vld [vmem:[%s4546_s0 + $0x1a0] sm:$0xff] }
  0x6b   : > { %2947 = vmatprep.mubr.f32.mxu0 %v4209_v46  ;;  %3211 = vmatprep.subr.bf16.mxu1 %v3210_v45  ;;  %v3222_v34 = vpack.c.bf16 %v2225_v28, %v2224_v26  ;;  %v2230_v26 = vld [vmem:[%s4546_s0 + $0x1d0] sm:$0xff]  ;;  %v2231_v28 = vld [vmem:[%s4546_s0 + $0x1d8] sm:$0xff] }
  0x6c   : > { %2724 = vmatmul.mubr.f32.gmra.mrb[14].mxu1 %v4218_v55  ;;  %3339 = vmatprep.subr.bf16.mxu0 %v3338_v49 }
  0x6d   : > { %2948 = vmatmul.mubr.f32.gmra.mrb[14].mxu0 %v4227_v62  ;;  %3213 = vmatpush3.bf16.msra.mxu1 %v3210_v45  ;;  %v2226_v45 = vld [vmem:[%s4546_s0 + $0x1b0] sm:$0xff] }
  0x6e   : > { %3341 = vmatpush3.bf16.msra.mxu0 %v3338_v49  ;;  %2758 = vmatprep.mubr.f32.mxu1 %v690_v1  ;;  %v2227_v49 = vld [vmem:[%s4546_s0 + $0x1b8] sm:$0xff]  ;;  %v3354_v1 = vpack.c.bf16 %v2291_v54, %v2290_v50  ;;  %v2296_v50 = vld [vmem:[%s4546_s0 + $0x3e0] sm:$0xff] }
  0x6f   : > { %2982 = vmatprep.mubr.f32.mxu0 %v4065_v15  ;;  %3215 = vmatprep.subr.bf16.mxu1 %v3214_v2  ;;  %v3226_v58 = vpack.c.bf16 %v2227_v49, %v2226_v45  ;;  %v2232_v45 = vld [vmem:[%s4546_s0 + $0x1e0] sm:$0xff]  ;;  %v2233_v49 = vld [vmem:[%s4546_s0 + $0x1e8] sm:$0xff] }
  0x70   : > { %2759 = vmatmul.mubr.f32.vlgmr.msra.gmra.mrb[0].mxu1 %v4045_v7  ;;  %3343 = vmatprep.subr.bf16.mxu0 %v3342_v6  ;;  %v2289_v7 = vld [vmem:[%s4546_s0 + $0x3a8] sm:$0xff]  ;;  %v3238_v54 = vpack.c.bf16 %v2233_v49, %v2232_v45 }
  0x71   : > { %2983 = vmatmul.mubr.f32.vlgmr.msra.gmra.mrb[0].mxu0 %v4077_v21  ;;  %3217 = vmatpush3.bf16.msra.mxu1 %v3214_v2  ;;  %v3350_v35 = vpack.c.bf16 %v2289_v7, %v2288_v29  ;;  %v2228_v2 = vld [vmem:[%s4546_s0 + $0x1c0] sm:$0xff]  ;;  %v2294_v29 = vld [vmem:[%s4546_s0 + $0x3d0] sm:$0xff]  ;;  %v2295_v7 = vld [vmem:[%s4546_s0 + $0x3d8] sm:$0xff] }
  0x72   : > { %3345 = vmatpush3.bf16.msra.mxu0 %v3342_v6  ;;  %2761 = vmatprep.mubr.f32.mxu1 %v4062_v14  ;;  %v2229_v6 = vld [vmem:[%s4546_s0 + $0x1c8] sm:$0xff] }
  0x73   : > { %2985 = vmatprep.mubr.f32.mxu0 %v4089_v25  ;;  %3219 = vmatprep.subr.bf16.mxu1 %v3218_v18  ;;  %v2305_v45 = vld [vmem:[%s4546_s0 + $0x428] sm:$0xff] }
  0x74   : > { %2762 = vmatmul.mubr.f32.gmra.mrb[2].mxu1 %v4068_v17  ;;  %3347 = vmatprep.subr.bf16.mxu0 %v3346_v22 }
  0x75   : > { %2986 = vmatmul.mubr.f32.gmra.mrb[2].mxu0 %v4101_v32  ;;  %3221 = vmatpush3.bf16.msra.mxu1 %v3218_v18  ;;  %v3230_v18 = vpack.c.bf16 %v2229_v6, %v2228_v2  ;;  %v2235_v2 = vld [vmem:[%s4546_s0 + $0x1f8] sm:$0xff]  ;;  %v2298_v6 = vld [vmem:[%s4546_s0 + $0x3f0] sm:$0xff] }
  0x76   : > { %3349 = vmatpush3.bf16.msra.mxu0 %v3346_v22  ;;  %2764 = vmatprep.mubr.f32.mxu1 %v4086_v24  ;;  %v3358_v22 = vpack.c.bf16 %v2293_v10, %v2292_v9  ;;  %v2299_v9 = vld [vmem:[%s4546_s0 + $0x3f8] sm:$0xff] }
  0x77   : > { %2988 = vmatprep.mubr.f32.mxu0 %v4113_v38  ;;  %3223 = vmatprep.subr.bf16.mxu1 %v3222_v34 }
  0x78   : > { %2765 = vmatmul.mubr.f32.gmra.mrb[4].mxu1 %v4092_v27  ;;  %3351 = vmatprep.subr.bf16.mxu0 %v3350_v35 }
  0x79   : > { %2989 = vmatmul.mubr.f32.gmra.mrb[4].mxu0 %v4125_v48  ;;  %3225 = vmatpush3.bf16.msra.mxu1 %v3222_v34  ;;  %v3234_v34 = vpack.c.bf16 %v2231_v28, %v2230_v26  ;;  %v1482_v26 = vld [vmem:[#allocation2 + $0x130] sm:$0xff] }
  0x7a   : > { %3353 = vmatpush3.bf16.msra.mxu0 %v3350_v35  ;;  %2767 = vmatprep.mubr.f32.mxu1 %v4110_v36  ;;  %v3362_v35 = vpack.c.bf16 %v2295_v7, %v2294_v29  ;;  %v2302_v29 = vld [vmem:[%s4546_s0 + $0x410] sm:$0xff]  ;;  %v2303_v7 = vld [vmem:[%s4546_s0 + $0x418] sm:$0xff] }
  0x7b   : > { %2991 = vmatprep.mubr.f32.mxu0 %v4278_v59  ;;  %3227 = vmatprep.subr.bf16.mxu1 %v3226_v58 }
  0x7c   : > { %2768 = vmatmul.mubr.f32.gmra.mrb[6].mxu1 %v4116_v42  ;;  %3355 = vmatprep.subr.bf16.mxu0 %v3354_v1 }
  0x7d   : > { %2992 = vmatmul.mubr.f32.gmra.mrb[6].mxu0 %v1474_v12  ;;  %3229 = vmatpush3.bf16.msra.mxu1 %v3226_v58  ;;  %v4342_v12 = vld [vmem:[#allocation2 + $0x120] sm:$0xff] }
  0x7e   : > { %3357 = vmatpush3.bf16.msra.mxu0 %v3354_v1  ;;  %2770 = vmatprep.mubr.f32.mxu1 %v698_v16  ;;  %v2234_v1 = vld [vmem:[%s4546_s0 + $0x1f0] sm:$0xff]  ;;  %v3370_v16 = vpack.c.bf16 %v2299_v9, %v2298_v6 }
  0x7f   : > { %2994 = vmatprep.mubr.f32.mxu0 %v4158_v5  ;;  %3231 = vmatprep.subr.bf16.mxu1 %v3230_v18  ;;  %v3242_v10 = vpack.c.bf16 %v2235_v2, %v2234_v1 }
  0x80   : > { %2771 = vmatmul.mubr.f32.gmra.mrb[8].mxu1 %v4138_v56  ;;  %3359 = vmatprep.subr.bf16.mxu0 %v3358_v22  ;;  %v2297_v56 = vld [vmem:[%s4546_s0 + $0x3e8] sm:$0xff] }
  0x81   : > { %2995 = vmatmul.mubr.f32.gmra.mrb[8].mxu0 %v4170_v13  ;;  %3233 = vmatpush3.bf16.msra.mxu1 %v3230_v18  ;;  %v3366_v58 = vpack.c.bf16 %v2297_v56, %v2296_v50  ;;  %v2300_v18 = vld [vmem:[%s4546_s0 + $0x400] sm:$0xff] }
  0x82   : > { %3361 = vmatpush3.bf16.msra.mxu0 %v3358_v22  ;;  %2773 = vmatprep.mubr.f32.mxu1 %v4155_v4  ;;  %v2301_v22 = vld [vmem:[%s4546_s0 + $0x408] sm:$0xff] }
  0x83   : > { %2997 = vmatprep.mubr.f32.mxu0 %v4182_v20  ;;  %3235 = vmatprep.subr.bf16.mxu1 %v3234_v34  ;;  %v3374_v28 = vpack.c.bf16 %v2301_v22, %v2300_v18 }
  0x84   : > { %2774 = vmatmul.mubr.f32.gmra.mrb[10].mxu1 %v4161_v8  ;;  %3363 = vmatprep.subr.bf16.mxu0 %v3362_v35 }
  0x85   : > { %2998 = vmatmul.mubr.f32.gmra.mrb[10].mxu0 %v4194_v30  ;;  %3237 = vmatpush3.bf16.msra.mxu1 %v3234_v34  ;;  %v3378_v34 = vpack.c.bf16 %v2303_v7, %v2302_v29 }
  0x86   : > { %3365 = vmatpush3.bf16.msra.mxu0 %v3362_v35  ;;  %2776 = vmatprep.mubr.f32.mxu1 %v4179_v19  ;;  %v2304_v35 = vld [vmem:[%s4546_s0 + $0x420] sm:$0xff] }
  0x87   : > { %3000 = vmatprep.mubr.f32.mxu0 %v4206_v44  ;;  %3239 = vmatprep.subr.bf16.mxu1 %v3238_v54 }
  0x88   : > { %2777 = vmatmul.mubr.f32.gmra.mrb[12].mxu1 %v4185_v23  ;;  %3367 = vmatprep.subr.bf16.mxu0 %v3366_v58 }
  0x89   : > { %3001 = vmatmul.mubr.f32.gmra.mrb[12].mxu0 %v4218_v55  ;;  %3241 = vmatpush3.bf16.msra.mxu1 %v3238_v54 }
  0x8a   : > { %3369 = vmatpush3.bf16.msra.mxu0 %v3366_v58  ;;  %2779 = vmatprep.mubr.f32.mxu1 %v4203_v39 }
  0x8b   : > { %3003 = vmatprep.mubr.f32.mxu0 %v4342_v12  ;;  %3243 = vmatprep.subr.bf16.mxu1 %v3242_v10 }
  0x8c   : > { %2780 = vmatmul.mubr.f32.gmra.mrb[14].mxu1 %v4209_v46  ;;  %3371 = vmatprep.subr.bf16.mxu0 %v3370_v16 }
  0x8d   : > { %3004 = vmatmul.mubr.f32.gmra.mrb[14].mxu0 %v1482_v26  ;;  %3245 = vmatpush3.bf16.msra.mxu1 %v3242_v10  ;;  %v4454_v10 = vld [vmem:[%s4547_s1] ss:$0 sm:$0xff] }
  0x8e   : > { %3373 = vmatpush3.bf16.msra.mxu0 %v3370_v16  ;;  %2814 = vmatprep.mubr.f32.mxu1 %v4054_v11  ;;  %v2306_v11 = vld [vmem:[%s4546_s0 + $0x430] sm:$0xff] }
  0x8f   : > { %3038 = vmatprep.mubr.f32.mxu0 %v3814_v31  ;;  %3375 = vmatprep.subr.bf16.mxu0 %v3374_v28  ;;  %v3382_v31 = vpack.c.bf16 %v2305_v45, %v2304_v35 }
  0x90   : > { %2815 = vmatmul.mubr.f32.vlgmr.msra.gmra.mrb[0].mxu1 %v4065_v15  ;;  %3406 = vmatprep.subr.bf16.mxu1 %v3374_v28  ;;  %v2307_v15 = vld [vmem:[%s4546_s0 + $0x438] sm:$0xff] }
  0x91   : > { %3039 = vmatmul.mubr.f32.vlgmr.msra.gmra.mrb[0].mxu0 %v3818_v33  ;;  %3414 = vmatpush3.bf16.msra.mxu1 %v3374_v28  ;;  %v3386_v33 = vpack.c.bf16 %v2307_v15, %v2306_v11 }
  0x92   : > { %3377 = vmatpush3.bf16.msra.mxu0 %v3374_v28  ;;  %2817 = vmatprep.mubr.f32.mxu1 %v4077_v21  ;;  %v2309_v21 = vld [vmem:[%s4546_s0 + $0x448] sm:$0xff] }
  0x93   : > { %3041 = vmatprep.mubr.f32.mxu0 %v3828_v37  ;;  %3379 = vmatprep.subr.bf16.mxu0 %v3378_v34  ;;  %v2308_v37 = vld [vmem:[%s4546_s0 + $0x440] sm:$0xff] }
  0x94   : > { %2818 = vmatmul.mubr.f32.gmra.mrb[2].mxu1 %v4089_v25  ;;  %3407 = vmatprep.subr.bf16.mxu1 %v3378_v34  ;;  %v2310_v25 = vld [vmem:[%s4546_s0 + $0x450] sm:$0xff] }
  0x95   : > { %3042 = vmatmul.mubr.f32.gmra.mrb[2].mxu0 %v3838_v40  ;;  %3415 = vmatpush3.bf16.msra.mxu1 %v3378_v34  ;;  %v1668_v40 = vld [vmem:[#allocation2 + $0x91] sm:$0xff] }
  0x96   : > { %3381 = vmatpush3.bf16.msra.mxu0 %v3378_v34  ;;  %2820 = vmatprep.mubr.f32.mxu1 %v4101_v32  ;;  %v2312_v32 = vld [vmem:[%s4546_s0 + $0x460] sm:$0xff] }
  0x97   : > { %3044 = vmatprep.mubr.f32.mxu0 %v3842_v41  ;;  %3383 = vmatprep.subr.bf16.mxu0 %v3382_v31  ;;  %v3390_v41 = vpack.c.bf16 %v2309_v21, %v2308_v37 }
  0x98   : > { %2821 = vmatmul.mubr.f32.gmra.mrb[4].mxu1 %v4113_v38  ;;  %3408 = vmatprep.subr.bf16.mxu1 %v3382_v31  ;;  %v2313_v38 = vld [vmem:[%s4546_s0 + $0x468] sm:$0xff] }
  0x99   : > { %3045 = vmatmul.mubr.f32.gmra.mrb[4].mxu0 %v3846_v43  ;;  %3416 = vmatpush3.bf16.msra.mxu1 %v3382_v31  ;;  %v2311_v43 = vld [vmem:[%s4546_s0 + $0x458] sm:$0xff] }
  0x9a   : > { %3385 = vmatpush3.bf16.msra.mxu0 %v3382_v31  ;;  %2823 = vmatprep.mubr.f32.mxu1 %v4125_v48  ;;  %v2314_v48 = vld [vmem:[%s4546_s0 + $0x470] sm:$0xff] }
  0x9b   : > { %3047 = vmatprep.mubr.f32.mxu0 %v3856_v47  ;;  %3387 = vmatprep.subr.bf16.mxu0 %v3386_v33  ;;  %v3394_v47 = vpack.c.bf16 %v2311_v43, %v2310_v25 }
  0x9c   : > { %2824 = vmatmul.mubr.f32.gmra.mrb[6].mxu1 %v4278_v59  ;;  %3409 = vmatprep.subr.bf16.mxu1 %v3386_v33 }
  0x9d   : > { %3048 = vmatmul.mubr.f32.gmra.mrb[6].mxu0 %v1668_v40  ;;  %3417 = vmatpush3.bf16.msra.mxu1 %v3386_v33 }
  0x9e   : > { %3389 = vmatpush3.bf16.msra.mxu0 %v3386_v33  ;;  %2826 = vmatprep.mubr.f32.mxu1 %v4147_v0  ;;  %v2315_v0 = vld [vmem:[%s4546_s0 + $0x478] sm:$0xff] }
  0x9f   : > { %3050 = vmatprep.mubr.f32.mxu0 %v3870_v51  ;;  %3391 = vmatprep.subr.bf16.mxu0 %v3390_v41  ;;  %v3398_v51 = vpack.c.bf16 %v2313_v38, %v2312_v32 }
  0xa0   : > { %2827 = vmatmul.mubr.f32.gmra.mrb[8].mxu1 %v4158_v5  ;;  %3410 = vmatprep.subr.bf16.mxu1 %v3390_v41 }
  0xa1   : > { %3051 = vmatmul.mubr.f32.gmra.mrb[8].mxu0 %v3874_v53  ;;  %3418 = vmatpush3.bf16.msra.mxu1 %v3390_v41  ;;  %v3402_v53 = vpack.c.bf16 %v2315_v0, %v2314_v48 }
  0xa2   : > { %3393 = vmatpush3.bf16.msra.mxu0 %v3390_v41  ;;  %2829 = vmatprep.mubr.f32.mxu1 %v4170_v13 }
  0xa3   : > { %3053 = vmatprep.mubr.f32.mxu0 %v3884_v57  ;;  %3395 = vmatprep.subr.bf16.mxu0 %v3394_v47  ;;  %v1676_v57 = vld [vmem:[#allocation2 + $0x131] sm:$0xff] }
  0xa4   : > { %2830 = vmatmul.mubr.f32.gmra.mrb[10].mxu1 %v4182_v20  ;;  %3411 = vmatprep.subr.bf16.mxu1 %v3394_v47 }
  0xa5   : > { %3054 = vmatmul.mubr.f32.gmra.mrb[10].mxu0 %v3894_v60  ;;  %3419 = vmatpush3.bf16.msra.mxu1 %v3394_v47  ;;  %v1870_v60 = vld [vmem:[#allocation2 + $0x132] sm:$0xff] }
  0xa6   : > { %3397 = vmatpush3.bf16.msra.mxu0 %v3394_v47  ;;  %2832 = vmatprep.mubr.f32.mxu1 %v4194_v30 }
  0xa7   : > { %3056 = vmatprep.mubr.f32.mxu0 %v3898_v61  ;;  %3399 = vmatprep.subr.bf16.mxu0 %v3398_v51  ;;  %v1862_v61 = vld [vmem:[#allocation2 + $0x92] sm:$0xff] }
  0xa8   : > { %2833 = vmatmul.mubr.f32.gmra.mrb[12].mxu1 %v4206_v44  ;;  %3412 = vmatprep.subr.bf16.mxu1 %v3398_v51 }
  0xa9   : > { %3057 = vmatmul.mubr.f32.gmra.mrb[12].mxu0 %v3902_v63  ;;  %3420 = vmatpush3.bf16.msra.mxu1 %v3398_v51 }
  0xaa   : > { %3401 = vmatpush3.bf16.msra.mxu0 %v3398_v51  ;;  %2835 = vmatprep.mubr.f32.mxu1 %v4218_v55 }
  0xab   : > { %3059 = vmatprep.mubr.f32.mxu0 %v3912_v3  ;;  %3403 = vmatprep.subr.bf16.mxu0 %v3402_v53 }
  0xac   : > { %2836 = vmatmul.mubr.f32.gmra.mrb[14].mxu1 %v4342_v12  ;;  %3413 = vmatprep.subr.bf16.mxu1 %v3402_v53 }
  0xad   : > { %3060 = vmatmul.mubr.f32.gmra.mrb[14].mxu0 %v1676_v57  ;;  %3421 = vmatpush3.bf16.msra.mxu1 %v3402_v53 }
  0xae   : > { %3405 = vmatpush3.bf16.msra.mxu0 %v3402_v53  ;;  %3094 = vmatprep.mubr.f32.mxu0 %v4062_v14 }
  0xaf   : > { %3106 = vmatprep.mubr.f32.mxu1 %v4155_v4 }
  0xb0   : > { %3107 = vmatmul.mubr.f32.vlgmr.msra.gmra.mrb[16].mxu1 %v4161_v8 }
  0xb1   : > { %3095 = vmatmul.mubr.f32.vlgmr.msra.gmra.mrb[0].mxu0 %v4068_v17  ;;  %3109 = vmatprep.mubr.f32.mxu1 %v4179_v19 }
  0xb2   : > { %3097 = vmatprep.mubr.f32.mxu0 %v4086_v24 }
  0xb4   : > { %3110 = vmatmul.mubr.f32.gmra.mrb[18].mxu1 %v4185_v23 }
  0xb5   : > { %3098 = vmatmul.mubr.f32.gmra.mrb[2].mxu0 %v4092_v27  ;;  %3112 = vmatprep.mubr.f32.mxu1 %v4203_v39 }
  0xb6   : > { %3100 = vmatprep.mubr.f32.mxu0 %v4110_v36 }
  0xb8   : > { %3113 = vmatmul.mubr.f32.gmra.mrb[20].mxu1 %v4209_v46 }
  0xb9   : > { %3101 = vmatmul.mubr.f32.gmra.mrb[4].mxu0 %v4116_v42  ;;  %3115 = vmatprep.mubr.f32.mxu1 %v4227_v62 }
  0xba   : > { %3103 = vmatprep.mubr.f32.mxu0 %v4134_v52 }
  0xbc   : > { %3116 = vmatmul.mubr.f32.gmra.mrb[22].mxu1 %v1870_v60 }
  0xbd   : > { %3104 = vmatmul.mubr.f32.gmra.mrb[6].mxu0 %v1862_v61 }
 0x163   : > { %v2816_v63 = vpop.f32.mrb[0].mxu1 }
 0x164   : > { %v983_v3 = vpop.f32.mrb[1].mxu1 }
 0x167   : > { %v2819_v14 = vpop.f32.mrb[2].mxu1 }
 0x168   : > { %v993_v17 = vpop.f32.mrb[3].mxu1 }
 0x16b   : > { %v4440_v24 = vpop.f32.mrb[4].mxu1 }
 0x16c   : > { %v4442_v27 = vpop.f32.mrb[5].mxu1 }
 0x16f   : > { %v4444_v36 = vpop.f32.mrb[6].mxu1 }
 0x170   : > { %v4446_v4 = vpop.f32.mrb[7].mxu1 }
 0x173   : > { %v2828_v42 = vpop.f32.mrb[8].mxu1 }
 0x174   : > { %v3052_v5 = vpop.f32.mrb[8].mxu0  ;;  %v1023_v8 = vpop.f32.mrb[9].mxu1 }
 0x175   : > { %v3430_v13 = vadd.f32 %v3052_v5, %v2828_v42  ;;  %v1800_v52 = vpop.f32.mrb[9].mxu0 }
 0x176   : > { %v3432_v19 = vadd.f32 %v1800_v52, %v1023_v8 }
 0x177   : > { %v2831_v20 = vpop.f32.mrb[10].mxu1 }
 0x178   : > { %v3055_v23 = vpop.f32.mrb[10].mxu0  ;;  %v1033_v30 = vpop.f32.mrb[11].mxu1 }
 0x179   : > { %v3434_v39 = vadd.f32 %v3055_v23, %v2831_v20  ;;  %v1810_v44 = vpop.f32.mrb[11].mxu0 }
 0x17a   : > { %v3436_v46 = vadd.f32 %v1810_v44, %v1033_v30 }
 0x17b   : > { %v2834_v55 = vpop.f32.mrb[12].mxu1 }
 0x17c   : > { %v3058_v62 = vpop.f32.mrb[12].mxu0  ;;  %v1043_v59 = vpop.f32.mrb[13].mxu1 }
 0x17d   : > { %v3438_v49 = vadd.f32 %v3058_v62, %v2834_v55  ;;  %v1820_v50 = vpop.f32.mrb[13].mxu0 }
 0x17e   : > { %v3440_v56 = vadd.f32 %v1820_v50, %v1043_v59 }
 0x17f   : > { %v2837_v54 = vpop.f32.mrb[14].mxu1 }
 0x180   : > { %v3061_v58 = vpop.f32.mrb[14].mxu0  ;;  %v1053_v1 = vpop.f32.mrb[15].mxu1 }
 0x181   : > { %v3442_v2 = vadd.f32 %v3061_v58, %v2837_v54  ;;  %v1830_v6 = vpop.f32.mrb[15].mxu0 }
 0x182   : > { %v3444_v9 = vadd.f32 %v1830_v6, %v1053_v1 }
 0x183   : > { %v3108_v12 = vpop.f32.mrb[16].mxu1 }
 0x184   : > { %v3096_v16 = vpop.f32.mrb[0].mxu0  ;;  %v3431_v18 = vadd.f32 %v3430_v13, %v3108_v12  ;;  %v1994_v22 = vpop.f32.mrb[17].mxu1 }
 0x185   : > { %v3422_v26 = vadd.f32 %v3096_v16, %v2816_v63  ;;  %v1954_v28 = vpop.f32.mrb[1].mxu0  ;;  %v3433_v29 = vadd.f32 %v3432_v19, %v1994_v22 }
 0x186   : > { %v2065_v7 = vadd.f32 %v3431_v18, %v4454_v10  ;;  %v3423_v34 = vadd.f32 %v1954_v28, %v983_v3 }
 0x187   : > { %v2057_v35 = vadd.f32 %v3422_v26, %v4454_v10  ;;  %v2064_v45 = vadd.f32 %v3433_v29, %v4454_v10  ;;  %v3111_v31 = vpop.f32.mrb[18].mxu1 }
 0x188   : > { %2081 = vst [vmem:[%s4459_s9 + $0x48] sm:$0xff] %v2065_v7  ;;  %v2056_v11 = vadd.f32 %v3423_v34, %v4454_v10  ;;  %v3099_v15 = vpop.f32.mrb[2].mxu0  ;;  %v3435_v33 = vadd.f32 %v3434_v39, %v3111_v31  ;;  %v2004_v37 = vpop.f32.mrb[19].mxu1 }
 0x189   : > { %2073 = vst [vmem:[%s4459_s9 + $0x8] sm:$0xff] %v2057_v35  ;;  %2080 = vst [vmem:[%s4459_s9 + $0x40] sm:$0xff] %v2064_v45  ;;  %v3424_v21 = vadd.f32 %v3099_v15, %v2819_v14  ;;  %v1964_v40 = vpop.f32.mrb[3].mxu0  ;;  %v3437_v41 = vadd.f32 %v3436_v46, %v2004_v37 }
 0x18a   : > { %2072 = vst [vmem:[%s4459_s9] sm:$0xff] %v2056_v11  ;;  %v2067_v25 = vadd.f32 %v3435_v33, %v4454_v10  ;;  %v3425_v43 = vadd.f32 %v1964_v40, %v993_v17 }
 0x18b   : > { %v2059_v47 = vadd.f32 %v3424_v21, %v4454_v10  ;;  %v2066_v32 = vadd.f32 %v3437_v41, %v4454_v10  ;;  %v3114_v38 = vpop.f32.mrb[20].mxu1 }
 0x18c   : > { %2083 = vst [vmem:[%s4459_s9 + $0x58] sm:$0xff] %v2067_v25  ;;  %v2058_v51 = vadd.f32 %v3425_v43, %v4454_v10  ;;  %v3102_v48 = vpop.f32.mrb[4].mxu0  ;;  %v3439_v0 = vadd.f32 %v3438_v49, %v3114_v38  ;;  %v2014_v53 = vpop.f32.mrb[21].mxu1 }
 0x18d   : > { %2075 = vst [vmem:[%s4459_s9 + $0x18] sm:$0xff] %v2059_v47  ;;  %2082 = vst [vmem:[%s4459_s9 + $0x50] sm:$0xff] %v2066_v32  ;;  %v3426_v57 = vadd.f32 %v3102_v48, %v4440_v24  ;;  %v1974_v60 = vpop.f32.mrb[5].mxu0  ;;  %v3441_v61 = vadd.f32 %v3440_v56, %v2014_v53 }
 0x18e   : > { %2074 = vst [vmem:[%s4459_s9 + $0x10] sm:$0xff] %v2058_v51  ;;  %v2069_v63 = vadd.f32 %v3439_v0, %v4454_v10  ;;  %v3427_v3 = vadd.f32 %v1974_v60, %v4442_v27 }
 0x18f   : > { %v2061_v14 = vadd.f32 %v3426_v57, %v4454_v10  ;;  %v2068_v17 = vadd.f32 %v3441_v61, %v4454_v10  ;;  %v3117_v42 = vpop.f32.mrb[22].mxu1 }
 0x190   : > { %2085 = vst [vmem:[%s4459_s9 + $0x68] sm:$0xff] %v2069_v63  ;;  %v2060_v5 = vadd.f32 %v3427_v3, %v4454_v10  ;;  %v3105_v8 = vpop.f32.mrb[6].mxu0  ;;  %v3443_v24 = vadd.f32 %v3442_v2, %v3117_v42  ;;  %v2024_v13 = vpop.f32.mrb[23].mxu1 }
 0x191   : > { %2077 = vst [vmem:[%s4459_s9 + $0x28] sm:$0xff] %v2061_v14  ;;  %2084 = vst [vmem:[%s4459_s9 + $0x60] sm:$0xff] %v2068_v17  ;;  %v3428_v27 = vadd.f32 %v3105_v8, %v4444_v36  ;;  %v1984_v52 = vpop.f32.mrb[7].mxu0  ;;  %v3445_v19 = vadd.f32 %v3444_v9, %v2024_v13 }
 0x192   : > { %2076 = vst [vmem:[%s4459_s9 + $0x20] sm:$0xff] %v2060_v5  ;;  %v2071_v20 = vadd.f32 %v3443_v24, %v4454_v10  ;;  %v3429_v23 = vadd.f32 %v1984_v52, %v4446_v4 }
 0x193   : > { %v2063_v30 = vadd.f32 %v3428_v27, %v4454_v10  ;;  %v2070_v39 = vadd.f32 %v3445_v19, %v4454_v10 }
 0x194   : > { %2087 = vst [vmem:[%s4459_s9 + $0x78] sm:$0xff] %v2071_v20  ;;  %v2062_v36 = vadd.f32 %v3429_v23, %v4454_v10 }
 0x195   : > { %2079 = vst [vmem:[%s4459_s9 + $0x38] sm:$0xff] %v2063_v30  ;;  %2086 = vst [vmem:[%s4459_s9 + $0x70] sm:$0xff] %v2070_v39 }
 0x196   : > { %2078 = vst [vmem:[%s4459_s9 + $0x30] sm:$0xff] %v2062_v36 }
 0x197   : > { %3605 = shalt.err (!%p3602_p3)
}
 0x198   : > { %s3606_s28 = scalar_lea.hbm %s4494_s19, 2048  ;;  %s3610_s5 = scalar_lea.hbm %s4549_s3, 4096 }
 0x199   : > { %p3607_p4 = scmp.ne.s32.totalorder %s4494_s19, %s3606_s28  ;;  %p3611_p9 = scmp.lt.u32.totalorder %s4494_s19, %s4549_s3 }
 0x19a   : > { %p3612_p10 = scmp.lt.u32.totalorder %s3610_s5, %s3606_s28  ;;  %p3614_p12 = scmp.lt.u32.totalorder %s3606_s28, %s4494_s19 }
 0x19b   : > { %p3608_p7 = pnand %p3607_p4, %p3718_p5 }
 0x19c   : > { %p3613_p11 = por %p3612_p10, %p3611_p9 }
 0x19d   : > { %p3609_p8 = pneg %p3608_p7 }
 0x19e   : > { %p3615_p13 = por %p3614_p12, %p3613_p11 }
 0x1a0   : > { %p3616_p0 = pnand %p3615_p13, %p3609_p8 }
 0x1a2   : > { %3619 = shalt.err (!%p3616_p0)
}
 0x1a3   : > { %s3658_s25 = smov 128   ;;  %s3659_s8 = smov 8  }
 0x1a4   : > { %3550 = dma.vmem_to_hbm [thread:$0]  (%p3718_p5), %s4496_s17, 2048, %s4494_s19, %s4505_s20, %s3658_s25, %s3658_s25, %s3659_s8  }
 0x1a5 PF: > { %p3556_p1 = scmp.ge.s32.totalorder %s3654_s15, 2  ;;  %s2118_s9 = sand.u32 1, %s3642_s12  }
 0x1a6   : > { %s2119_s11 = scalar_lea.sflag [#allocation4], %s2118_s9 }
 0x1a7   : > { %p3553_p2 = pnand %p3556_p1, %p3722_p6 }
 0x1a9   : > { %3637 = dma.done.wait (!%p3553_p2), %s2119_s11, 2048  }
 0x1aa   : > { %3639 = vsyncadd (!%p3553_p2), %s2119_s11, 4294965248  ;;  %p13_p3 = scmp.ge.s32.totalorder %s3705_s18, 4   ;;  %s4553_s12 = smov %s3646_s13 }
 0x1ab   : > { %s4554_s13 = smov %s3650_s14  ;;  %s4555_s14 = smov %s3716_s21 }
 0x1ac   : > { %s4556_s15 = smov %s3705_s18  ;;  %15 = sbr.rel (!%p13_p3) target bundleno = 3 (0x3), region = 108 }
 0x1b3   :  { %2124 = vsyncpa [#allocation4], 1 }
 0x1b4   :  { %2126 = vsyncpa [#allocation4 + $0x1], 1 }

</bundles_post_ra>
